<compile_context>
chip_gen: v7x
topology: tpu7x:2x2x1
jax: 0.10.0
libtpu: 0.0.40
codegen_flags: <defaults>
</compile_context>

<pallas_src>
import jax
import jax.numpy as jnp
from jax.experimental import pallas as pl
from jax.experimental.pallas import tpu as pltpu

NEG_SLOPE = 0.1
ARCHITECTURE = [('Conv', 128), ('Conv', 256), ('Conv', 128),
                ('Linear', 256), ('Linear', 128), ('Linear', 64),
                ('Linear', 32), ('Linear', 1)]
_N_CONV = sum(1 for kind, _ in ARCHITECTURE if kind == 'Conv')
_LIN_DIMS = [out for kind, out in ARCHITECTURE if kind == 'Linear']  # [256,128,64,32,1]


# ---------------------------------------------------------------------------
# Fused Pallas kernel
# ---------------------------------------------------------------------------
def _leaky(v):
    return jnp.where(v > 0, v, NEG_SLOPE * v)


def _tree_sum(xs):
    xs = list(xs)
    while len(xs) > 1:
        nxt = [xs[i] + xs[i + 1] for i in range(0, len(xs) - 1, 2)]
        if len(xs) % 2:
            nxt.append(xs[-1])
        xs = nxt
    return xs[0]


def _make_fused_kernel(batch: int, num_nodes: int):
    """Ref layout: (a_big, x_all, wc0, wc1, wc2, w1, tail_slab, biases, out)."""

    def kernel(a_ref, x_ref, wc0_ref, wc1_ref, wc2_ref, w1_ref, wt_ref,
               b_ref, o_ref):
        a = a_ref[...]                                   # (N*B, N*B)  bf16
        h = x_ref[...]                                   # (N*B, F)    bf16
        bi = 0

        # --- GCNConv blocks: leaky( A_big @ (H @ W) + b ) -------------------
        for w_ref in (wc0_ref, wc1_ref, wc2_ref):
            t = jnp.dot(h.astype(jnp.bfloat16), w_ref[...],
                        preferred_element_type=jnp.float32)
            t = jnp.dot(a, t.astype(jnp.bfloat16),
                        preferred_element_type=jnp.float32)
            t = t + b_ref[pl.ds(bi, 1), pl.ds(0, t.shape[1])]   # f32 bias/act
            h = _leaky(t)
            bi += 1

        # --- First Linear: per-sample torch .view(-1, N*C) flatten expressed
        #     as N INDEPENDENT partial dots (node-major rows are contiguous)
        #     + one balanced tree sum — no serialized accumulate chain.
        hb = h.astype(jnp.bfloat16)
        parts = [
            jnp.dot(hb[n * batch:(n + 1) * batch, :], w1_ref[n],
                    preferred_element_type=jnp.float32)
            for n in range(num_nodes)
        ]
        t = _tree_sum(parts) + b_ref[pl.ds(bi, 1), pl.ds(0, _LIN_DIMS[0])]
        h = _leaky(t)
        bi += 1

        # --- Tail Linear layers (last one has no activation) ----------------
        din = _LIN_DIMS[0]
        for j, dout in enumerate(_LIN_DIMS[1:]):
            w = wt_ref[j][:din, :dout]                   # bf16 slab slice
            t = jnp.dot(h.astype(jnp.bfloat16), w,
                        preferred_element_type=jnp.float32)
            t = t + b_ref[pl.ds(bi, 1), pl.ds(0, dout)]
            h = _leaky(t) if j < len(_LIN_DIMS) - 2 else t
            bi += 1
            din = dout

        o_ref[...] = h.astype(o_ref.dtype)               # (B, 1) store

    return kernel


def _vmem_spec():
    return pl.BlockSpec(memory_space=pltpu.MemorySpace.VMEM)


# ---------------------------------------------------------------------------
# One-time host-side parameter packing (bf16 weights, packed biases/slab)
# ---------------------------------------------------------------------------
def pack_params(params, num_nodes):
    conv_p, lin_p = params[:_N_CONV], params[_N_CONV:]
    wc = tuple(w.astype(jnp.bfloat16) for w, _ in conv_p)

    # First Linear weight reshaped row-major to (num_nodes, C, 256) so the
    # kernel contracts per-node without flattening the activations.
    w1, _ = lin_p[0]
    c_per_node = w1.shape[0] // num_nodes
    w1_r = w1.reshape(num_nodes, c_per_node, w1.shape[1]).astype(jnp.bfloat16)

    # Tail Linear weights packed into one zero-padded bf16 slab (1 DMA).
    tail = lin_p[1:]
    max_in = max(w.shape[0] for w, _ in tail)
    max_out = max(w.shape[1] for w, _ in tail)
    slab = jnp.zeros((len(tail), max_in, max_out), jnp.bfloat16)
    for j, (w, _) in enumerate(tail):
        slab = slab.at[j, :w.shape[0], :w.shape[1]].set(w.astype(jnp.bfloat16))

    # All biases packed into one zero-padded f32 array (1 DMA).
    max_b = max(b.shape[0] for _, b in params)
    biases = jnp.zeros((len(params), max_b), jnp.float32)
    for i, (_, b) in enumerate(params):
        biases = biases.at[i, :b.shape[0]].set(b.astype(jnp.float32))

    return (*wc, w1_r, slab, biases)


# ---------------------------------------------------------------------------
# Batched fused forward
# ---------------------------------------------------------------------------
@jax.jit
def latnet_forward(a_hat, x_batch, packed):
    """x_batch: (B, num_nodes, in_features)  ->  (B, 1)."""
    wc0, wc1, wc2, w1_r, tail_slab, biases = packed
    B, N, F = x_batch.shape

    # Node-major row stacking (row n*B + b): GCN propagation over the shared
    # graph becomes one dense matmul with A_big = kron(A_hat, I_B), and the
    # per-node blocks needed by the first Linear are contiguous row slices.
    x_all = jnp.transpose(x_batch, (1, 0, 2)).reshape(N * B, F)
    x_all = x_all.astype(jnp.bfloat16)
    a_big = jnp.kron(a_hat, jnp.eye(B, dtype=a_hat.dtype)).astype(jnp.bfloat16)

    kernel = _make_fused_kernel(B, N)
    return pl.pallas_call(
        kernel,
        out_shape=jax.ShapeDtypeStruct((B, 1), jnp.float32),
        in_specs=[_vmem_spec()] * 8,
        out_specs=_vmem_spec(),
    )(a_big, x_all, wc0, wc1, wc2, w1_r, tail_slab, biases)
    # TODO(synk): for large B, split the batch over a leading "parallel" grid
    # axis (per-chunk A_big blocks) so megacore / v7x's 2 TensorCores share it.
    # TODO(synk): for large num_nodes, tile A_hat by node rows ((8,128)
    # multiples, row axis "parallel") instead of whole-array residency —
    # dense A_hat residency hits v7x's smaller VMEM at ~half the N of v5e/v6e.


# ---------------------------------------------------------------------------
# Parameter construction (deterministic, synthetic) + adjacency glue
# ---------------------------------------------------------------------------
def init_params(key, num_nodes, in_features):
    params = []
    in_ch = in_features
    first_fcn = True
    for block, out_ch in ARCHITECTURE:
        if block == 'Linear' and first_fcn:
            in_ch = num_nodes * in_ch
            first_fcn = False
        key, kw, kb = jax.random.split(key, 3)
        scale = 1.0 / jnp.sqrt(jnp.float32(in_ch))
        w = jax.random.uniform(kw, (in_ch, out_ch), jnp.float32, -scale, scale)
        b = jax.random.uniform(kb, (out_ch,), jnp.float32, -scale, scale)
        params.append((w, b))
        in_ch = out_ch
    return tuple(params)


def build_normalized_adjacency(edge_index, num_nodes):
    """Dense A_hat = D^-1/2 (A + I) D^-1/2 (symmetric GCN normalization)."""
    src, dst = edge_index
    a = jnp.zeros((num_nodes, num_nodes), jnp.float32)
    a = a.at[src, dst].set(1.0)
    a = jnp.maximum(a, a.T)                        # undirected
    a = a + jnp.eye(num_nodes, dtype=jnp.float32)  # self loops
    deg = a.sum(axis=1)
    dinv = jnp.where(deg > 0, 1.0 / jnp.sqrt(deg), 0.0)
    return dinv[:, None] * a * dinv[None, :]


# ---------------------------------------------------------------------------
# Pure-JAX single-sample reference (f32, HIGHEST precision)
# ---------------------------------------------------------------------------
def reference_forward(a_hat, x, params):
    hp = jax.lax.Precision.HIGHEST
    h = x
    for i, (kind, _) in enumerate(ARCHITECTURE):
        w, b = params[i]
        if kind == 'Conv':
            t = jnp.dot(a_hat, jnp.dot(h, w, precision=hp), precision=hp) + b
            h = _leaky(t)
        else:
            h = h.reshape(-1, w.shape[0])          # torch .view(-1, in_feats)
            t = jnp.dot(h, w, precision=hp) + b
            h = _leaky(t) if i < len(ARCHITECTURE) - 1 else t
    return h                                       # (1, 1)


if __name__ == "__main__":
    num_nodes = 8
    in_features = 16
    batch = 4

    key = jax.random.PRNGKey(0)
    key, kx = jax.random.split(key)
    x_batch = jax.random.normal(kx, (batch, num_nodes, in_features), jnp.float32)

    # deterministic ring graph (made undirected by symmetrization)
    src = jnp.arange(num_nodes, dtype=jnp.int32)
    dst = (src + 1) % num_nodes
    edge_index = jnp.stack([src, dst], axis=0)     # [2, E]

    params = init_params(key, num_nodes, in_features)

    # Graph and weights are static: normalize / pack once, outside the
    # per-call path.
    a_hat = build_normalized_adjacency(edge_index, num_nodes)
    packed = pack_params(params, num_nodes)
    a_hat, packed = jax.block_until_ready((a_hat, packed))

    out = latnet_forward(a_hat, x_batch, packed)
    out = jax.block_until_ready(out)
    assert out.shape == (batch, 1), out.shape

    ref = jnp.concatenate(
        [reference_forward(a_hat, x_batch[b], params) for b in range(batch)],
        axis=0)                                    # (B, 1)
    # bf16 matmul operands (f32 accumulation) vs. f32-HIGHEST reference:
    # 5e-2 tolerance accommodates the expected ~1% drift.
    assert bool(jnp.allclose(out, ref, rtol=5e-2, atol=5e-2)), (out, ref)

    print("KERNEL_OK")
</pallas_src>

<mosaic_0001>
module attributes {stable_mosaic.version = 11 : i64} {
  func.func @kernel(%arg0: memref<32x32xbf16, #tpu.memory_space<vmem>>, %arg1: memref<32x16xbf16, #tpu.memory_space<vmem>>, %arg2: memref<16x128xbf16, #tpu.memory_space<vmem>>, %arg3: memref<128x256xbf16, #tpu.memory_space<vmem>>, %arg4: memref<256x128xbf16, #tpu.memory_space<vmem>>, %arg5: memref<8x128x256xbf16, #tpu.memory_space<vmem>>, %arg6: memref<4x256x128xbf16, #tpu.memory_space<vmem>>, %arg7: memref<8x256xf32, #tpu.memory_space<vmem>>, %arg8: memref<4x1xf32, #tpu.memory_space<vmem>>) attributes {dimension_semantics = [], scalar_prefetch = 0 : i64, scratch_operands = 0 : i64, tpu.core_type = #tpu.core_type<tc>} {
    %c0 = arith.constant 0 : index
    %c0_0 = arith.constant 0 : index
    %0 = vector.load %arg0[%c0, %c0_0] : memref<32x32xbf16, #tpu.memory_space<vmem>>, vector<32x32xbf16>
    %c0_1 = arith.constant 0 : index
    %c0_2 = arith.constant 0 : index
    %1 = vector.load %arg1[%c0_1, %c0_2] : memref<32x16xbf16, #tpu.memory_space<vmem>>, vector<32x16xbf16>
    %c0_3 = arith.constant 0 : index
    %c0_4 = arith.constant 0 : index
    %2 = vector.load %arg2[%c0_3, %c0_4] : memref<16x128xbf16, #tpu.memory_space<vmem>>, vector<16x128xbf16>
    %cst = arith.constant dense<0.000000e+00> : vector<32x128xf32>
    %3 = tpu.matmul %1, %2, %cst {dimension_numbers = #tpu.dot_dimension_numbers<[1], [0], [0], [1], [0, 0, 1, 1], [], []>} : vector<32x16xbf16>, vector<16x128xbf16>, vector<32x128xf32> -> vector<32x128xf32>
    %4 = arith.truncf %3 : vector<32x128xf32> to vector<32x128xbf16>
    %cst_5 = arith.constant dense<0.000000e+00> : vector<32x128xf32>
    %5 = tpu.matmul %0, %4, %cst_5 {dimension_numbers = #tpu.dot_dimension_numbers<[1], [0], [0], [1], [0, 0, 1, 1], [], []>} : vector<32x32xbf16>, vector<32x128xbf16>, vector<32x128xf32> -> vector<32x128xf32>
    %c0_6 = arith.constant 0 : index
    %c0_7 = arith.constant 0 : index
    %6 = vector.load %arg7[%c0_6, %c0_7] : memref<8x256xf32, #tpu.memory_space<vmem>>, vector<1x128xf32>
    %7 = vector.broadcast %6 : vector<1x128xf32> to vector<32x128xf32>
    %8 = arith.addf %5, %7 : vector<32x128xf32>
    %cst_8 = arith.constant 0.000000e+00 : f32
    %9 = vector.broadcast %cst_8 : f32 to vector<32x128xf32>
    %10 = arith.cmpf ogt, %8, %9 : vector<32x128xf32>
    %cst_9 = arith.constant 1.000000e-01 : f32
    %11 = vector.broadcast %cst_9 : f32 to vector<32x128xf32>
    %12 = arith.mulf %11, %8 : vector<32x128xf32>
    %13 = arith.select %10, %8, %12 : vector<32x128xi1>, vector<32x128xf32>
    %14 = arith.truncf %13 : vector<32x128xf32> to vector<32x128xbf16>
    %c0_10 = arith.constant 0 : index
    %c0_11 = arith.constant 0 : index
    %15 = vector.load %arg3[%c0_10, %c0_11] : memref<128x256xbf16, #tpu.memory_space<vmem>>, vector<128x256xbf16>
    %cst_12 = arith.constant dense<0.000000e+00> : vector<32x256xf32>
    %16 = tpu.matmul %14, %15, %cst_12 {dimension_numbers = #tpu.dot_dimension_numbers<[1], [0], [0], [1], [0, 0, 1, 1], [], []>} : vector<32x128xbf16>, vector<128x256xbf16>, vector<32x256xf32> -> vector<32x256xf32>
    %17 = arith.truncf %16 : vector<32x256xf32> to vector<32x256xbf16>
    %cst_13 = arith.constant dense<0.000000e+00> : vector<32x256xf32>
    %18 = tpu.matmul %0, %17, %cst_13 {dimension_numbers = #tpu.dot_dimension_numbers<[1], [0], [0], [1], [0, 0, 1, 1], [], []>} : vector<32x32xbf16>, vector<32x256xbf16>, vector<32x256xf32> -> vector<32x256xf32>
    %c1 = arith.constant 1 : index
    %c0_14 = arith.constant 0 : index
    %19 = vector.load %arg7[%c1, %c0_14] : memref<8x256xf32, #tpu.memory_space<vmem>>, vector<1x256xf32>
    %20 = vector.broadcast %19 : vector<1x256xf32> to vector<32x256xf32>
    %21 = arith.addf %18, %20 : vector<32x256xf32>
    %cst_15 = arith.constant 0.000000e+00 : f32
    %22 = vector.broadcast %cst_15 : f32 to vector<32x256xf32>
    %23 = arith.cmpf ogt, %21, %22 : vector<32x256xf32>
    %cst_16 = arith.constant 1.000000e-01 : f32
    %24 = vector.broadcast %cst_16 : f32 to vector<32x256xf32>
    %25 = arith.mulf %24, %21 : vector<32x256xf32>
    %26 = arith.select %23, %21, %25 : vector<32x256xi1>, vector<32x256xf32>
    %27 = arith.truncf %26 : vector<32x256xf32> to vector<32x256xbf16>
    %c0_17 = arith.constant 0 : index
    %c0_18 = arith.constant 0 : index
    %28 = vector.load %arg4[%c0_17, %c0_18] : memref<256x128xbf16, #tpu.memory_space<vmem>>, vector<256x128xbf16>
    %cst_19 = arith.constant dense<0.000000e+00> : vector<32x128xf32>
    %29 = tpu.matmul %27, %28, %cst_19 {dimension_numbers = #tpu.dot_dimension_numbers<[1], [0], [0], [1], [0, 0, 1, 1], [], []>} : vector<32x256xbf16>, vector<256x128xbf16>, vector<32x128xf32> -> vector<32x128xf32>
    %30 = arith.truncf %29 : vector<32x128xf32> to vector<32x128xbf16>
    %cst_20 = arith.constant dense<0.000000e+00> : vector<32x128xf32>
    %31 = tpu.matmul %0, %30, %cst_20 {dimension_numbers = #tpu.dot_dimension_numbers<[1], [0], [0], [1], [0, 0, 1, 1], [], []>} : vector<32x32xbf16>, vector<32x128xbf16>, vector<32x128xf32> -> vector<32x128xf32>
    %c2 = arith.constant 2 : index
    %c0_21 = arith.constant 0 : index
    %32 = vector.load %arg7[%c2, %c0_21] : memref<8x256xf32, #tpu.memory_space<vmem>>, vector<1x128xf32>
    %33 = vector.broadcast %32 : vector<1x128xf32> to vector<32x128xf32>
    %34 = arith.addf %31, %33 : vector<32x128xf32>
    %cst_22 = arith.constant 0.000000e+00 : f32
    %35 = vector.broadcast %cst_22 : f32 to vector<32x128xf32>
    %36 = arith.cmpf ogt, %34, %35 : vector<32x128xf32>
    %cst_23 = arith.constant 1.000000e-01 : f32
    %37 = vector.broadcast %cst_23 : f32 to vector<32x128xf32>
    %38 = arith.mulf %37, %34 : vector<32x128xf32>
    %39 = arith.select %36, %34, %38 : vector<32x128xi1>, vector<32x128xf32>
    %40 = arith.truncf %39 : vector<32x128xf32> to vector<32x128xbf16>
    %41 = vector.extract_strided_slice %40 {offsets = [0, 0], sizes = [4, 128], strides = [1, 1]} : vector<32x128xbf16> to vector<4x128xbf16>
    %c0_24 = arith.constant 0 : index
    %c0_25 = arith.constant 0 : index
    %c0_26 = arith.constant 0 : index
    %42 = vector.load %arg5[%c0_24, %c0_25, %c0_26] : memref<8x128x256xbf16, #tpu.memory_space<vmem>>, vector<1x128x256xbf16>
    %43 = vector.shape_cast %42 : vector<1x128x256xbf16> to vector<128x256xbf16>
    %cst_27 = arith.constant dense<0.000000e+00> : vector<4x256xf32>
    %44 = tpu.matmul %41, %43, %cst_27 {dimension_numbers = #tpu.dot_dimension_numbers<[1], [0], [0], [1], [0, 0, 1, 1], [], []>} : vector<4x128xbf16>, vector<128x256xbf16>, vector<4x256xf32> -> vector<4x256xf32>
    %45 = vector.extract_strided_slice %40 {offsets = [4, 0], sizes = [4, 128], strides = [1, 1]} : vector<32x128xbf16> to vector<4x128xbf16>
    %c1_28 = arith.constant 1 : index
    %c0_29 = arith.constant 0 : index
    %c0_30 = arith.constant 0 : index
    %46 = vector.load %arg5[%c1_28, %c0_29, %c0_30] : memref<8x128x256xbf16, #tpu.memory_space<vmem>>, vector<1x128x256xbf16>
    %47 = vector.shape_cast %46 : vector<1x128x256xbf16> to vector<128x256xbf16>
    %cst_31 = arith.constant dense<0.000000e+00> : vector<4x256xf32>
    %48 = tpu.matmul %45, %47, %cst_31 {dimension_numbers = #tpu.dot_dimension_numbers<[1], [0], [0], [1], [0, 0, 1, 1], [], []>} : vector<4x128xbf16>, vector<128x256xbf16>, vector<4x256xf32> -> vector<4x256xf32>
    %49 = vector.extract_strided_slice %40 {offsets = [8, 0], sizes = [4, 128], strides = [1, 1]} : vector<32x128xbf16> to vector<4x128xbf16>
    %c2_32 = arith.constant 2 : index
    %c0_33 = arith.constant 0 : index
    %c0_34 = arith.constant 0 : index
    %50 = vector.load %arg5[%c2_32, %c0_33, %c0_34] : memref<8x128x256xbf16, #tpu.memory_space<vmem>>, vector<1x128x256xbf16>
    %51 = vector.shape_cast %50 : vector<1x128x256xbf16> to vector<128x256xbf16>
    %cst_35 = arith.constant dense<0.000000e+00> : vector<4x256xf32>
    %52 = tpu.matmul %49, %51, %cst_35 {dimension_numbers = #tpu.dot_dimension_numbers<[1], [0], [0], [1], [0, 0, 1, 1], [], []>} : vector<4x128xbf16>, vector<128x256xbf16>, vector<4x256xf32> -> vector<4x256xf32>
    %53 = vector.extract_strided_slice %40 {offsets = [12, 0], sizes = [4, 128], strides = [1, 1]} : vector<32x128xbf16> to vector<4x128xbf16>
    %c3 = arith.constant 3 : index
    %c0_36 = arith.constant 0 : index
    %c0_37 = arith.constant 0 : index
    %54 = vector.load %arg5[%c3, %c0_36, %c0_37] : memref<8x128x256xbf16, #tpu.memory_space<vmem>>, vector<1x128x256xbf16>
    %55 = vector.shape_cast %54 : vector<1x128x256xbf16> to vector<128x256xbf16>
    %cst_38 = arith.constant dense<0.000000e+00> : vector<4x256xf32>
    %56 = tpu.matmul %53, %55, %cst_38 {dimension_numbers = #tpu.dot_dimension_numbers<[1], [0], [0], [1], [0, 0, 1, 1], [], []>} : vector<4x128xbf16>, vector<128x256xbf16>, vector<4x256xf32> -> vector<4x256xf32>
    %57 = vector.extract_strided_slice %40 {offsets = [16, 0], sizes = [4, 128], strides = [1, 1]} : vector<32x128xbf16> to vector<4x128xbf16>
    %c4 = arith.constant 4 : index
    %c0_39 = arith.constant 0 : index
    %c0_40 = arith.constant 0 : index
    %58 = vector.load %arg5[%c4, %c0_39, %c0_40] : memref<8x128x256xbf16, #tpu.memory_space<vmem>>, vector<1x128x256xbf16>
    %59 = vector.shape_cast %58 : vector<1x128x256xbf16> to vector<128x256xbf16>
    %cst_41 = arith.constant dense<0.000000e+00> : vector<4x256xf32>
    %60 = tpu.matmul %57, %59, %cst_41 {dimension_numbers = #tpu.dot_dimension_numbers<[1], [0], [0], [1], [0, 0, 1, 1], [], []>} : vector<4x128xbf16>, vector<128x256xbf16>, vector<4x256xf32> -> vector<4x256xf32>
    %61 = vector.extract_strided_slice %40 {offsets = [20, 0], sizes = [4, 128], strides = [1, 1]} : vector<32x128xbf16> to vector<4x128xbf16>
    %c5 = arith.constant 5 : index
    %c0_42 = arith.constant 0 : index
    %c0_43 = arith.constant 0 : index
    %62 = vector.load %arg5[%c5, %c0_42, %c0_43] : memref<8x128x256xbf16, #tpu.memory_space<vmem>>, vector<1x128x256xbf16>
    %63 = vector.shape_cast %62 : vector<1x128x256xbf16> to vector<128x256xbf16>
    %cst_44 = arith.constant dense<0.000000e+00> : vector<4x256xf32>
    %64 = tpu.matmul %61, %63, %cst_44 {dimension_numbers = #tpu.dot_dimension_numbers<[1], [0], [0], [1], [0, 0, 1, 1], [], []>} : vector<4x128xbf16>, vector<128x256xbf16>, vector<4x256xf32> -> vector<4x256xf32>
    %65 = vector.extract_strided_slice %40 {offsets = [24, 0], sizes = [4, 128], strides = [1, 1]} : vector<32x128xbf16> to vector<4x128xbf16>
    %c6 = arith.constant 6 : index
    %c0_45 = arith.constant 0 : index
    %c0_46 = arith.constant 0 : index
    %66 = vector.load %arg5[%c6, %c0_45, %c0_46] : memref<8x128x256xbf16, #tpu.memory_space<vmem>>, vector<1x128x256xbf16>
    %67 = vector.shape_cast %66 : vector<1x128x256xbf16> to vector<128x256xbf16>
    %cst_47 = arith.constant dense<0.000000e+00> : vector<4x256xf32>
    %68 = tpu.matmul %65, %67, %cst_47 {dimension_numbers = #tpu.dot_dimension_numbers<[1], [0], [0], [1], [0, 0, 1, 1], [], []>} : vector<4x128xbf16>, vector<128x256xbf16>, vector<4x256xf32> -> vector<4x256xf32>
    %69 = vector.extract_strided_slice %40 {offsets = [28, 0], sizes = [4, 128], strides = [1, 1]} : vector<32x128xbf16> to vector<4x128xbf16>
    %c7 = arith.constant 7 : index
    %c0_48 = arith.constant 0 : index
    %c0_49 = arith.constant 0 : index
    %70 = vector.load %arg5[%c7, %c0_48, %c0_49] : memref<8x128x256xbf16, #tpu.memory_space<vmem>>, vector<1x128x256xbf16>
    %71 = vector.shape_cast %70 : vector<1x128x256xbf16> to vector<128x256xbf16>
    %cst_50 = arith.constant dense<0.000000e+00> : vector<4x256xf32>
    %72 = tpu.matmul %69, %71, %cst_50 {dimension_numbers = #tpu.dot_dimension_numbers<[1], [0], [0], [1], [0, 0, 1, 1], [], []>} : vector<4x128xbf16>, vector<128x256xbf16>, vector<4x256xf32> -> vector<4x256xf32>
    %73 = arith.addf %44, %48 : vector<4x256xf32>
    %74 = arith.addf %52, %56 : vector<4x256xf32>
    %75 = arith.addf %60, %64 : vector<4x256xf32>
    %76 = arith.addf %68, %72 : vector<4x256xf32>
    %77 = arith.addf %73, %74 : vector<4x256xf32>
    %78 = arith.addf %75, %76 : vector<4x256xf32>
    %79 = arith.addf %77, %78 : vector<4x256xf32>
    %c3_51 = arith.constant 3 : index
    %c0_52 = arith.constant 0 : index
    %80 = vector.load %arg7[%c3_51, %c0_52] : memref<8x256xf32, #tpu.memory_space<vmem>>, vector<1x256xf32>
    %81 = vector.broadcast %80 : vector<1x256xf32> to vector<4x256xf32>
    %82 = arith.addf %79, %81 : vector<4x256xf32>
    %cst_53 = arith.constant 0.000000e+00 : f32
    %83 = vector.broadcast %cst_53 : f32 to vector<4x256xf32>
    %84 = arith.cmpf ogt, %82, %83 : vector<4x256xf32>
    %cst_54 = arith.constant 1.000000e-01 : f32
    %85 = vector.broadcast %cst_54 : f32 to vector<4x256xf32>
    %86 = arith.mulf %85, %82 : vector<4x256xf32>
    %87 = arith.select %84, %82, %86 : vector<4x256xi1>, vector<4x256xf32>
    %c0_55 = arith.constant 0 : index
    %c0_56 = arith.constant 0 : index
    %c0_57 = arith.constant 0 : index
    %88 = vector.load %arg6[%c0_55, %c0_56, %c0_57] : memref<4x256x128xbf16, #tpu.memory_space<vmem>>, vector<1x256x128xbf16>
    %89 = vector.shape_cast %88 : vector<1x256x128xbf16> to vector<256x128xbf16>
    %90 = arith.truncf %87 : vector<4x256xf32> to vector<4x256xbf16>
    %cst_58 = arith.constant dense<0.000000e+00> : vector<4x128xf32>
    %91 = tpu.matmul %90, %89, %cst_58 {dimension_numbers = #tpu.dot_dimension_numbers<[1], [0], [0], [1], [0, 0, 1, 1], [], []>} : vector<4x256xbf16>, vector<256x128xbf16>, vector<4x128xf32> -> vector<4x128xf32>
    %c4_59 = arith.constant 4 : index
    %c0_60 = arith.constant 0 : index
    %92 = vector.load %arg7[%c4_59, %c0_60] : memref<8x256xf32, #tpu.memory_space<vmem>>, vector<1x128xf32>
    %93 = vector.broadcast %92 : vector<1x128xf32> to vector<4x128xf32>
    %94 = arith.addf %91, %93 : vector<4x128xf32>
    %cst_61 = arith.constant 0.000000e+00 : f32
    %95 = vector.broadcast %cst_61 : f32 to vector<4x128xf32>
    %96 = arith.cmpf ogt, %94, %95 : vector<4x128xf32>
    %cst_62 = arith.constant 1.000000e-01 : f32
    %97 = vector.broadcast %cst_62 : f32 to vector<4x128xf32>
    %98 = arith.mulf %97, %94 : vector<4x128xf32>
    %99 = arith.select %96, %94, %98 : vector<4x128xi1>, vector<4x128xf32>
    %c1_63 = arith.constant 1 : index
    %c0_64 = arith.constant 0 : index
    %c0_65 = arith.constant 0 : index
    %100 = vector.load %arg6[%c1_63, %c0_64, %c0_65] : memref<4x256x128xbf16, #tpu.memory_space<vmem>>, vector<1x256x128xbf16>
    %101 = vector.shape_cast %100 : vector<1x256x128xbf16> to vector<256x128xbf16>
    %102 = vector.extract_strided_slice %101 {offsets = [0, 0], sizes = [128, 64], strides = [1, 1]} : vector<256x128xbf16> to vector<128x64xbf16>
    %103 = arith.truncf %99 : vector<4x128xf32> to vector<4x128xbf16>
    %cst_66 = arith.constant dense<0.000000e+00> : vector<4x64xf32>
    %104 = tpu.matmul %103, %102, %cst_66 {dimension_numbers = #tpu.dot_dimension_numbers<[1], [0], [0], [1], [0, 0, 1, 1], [], []>} : vector<4x128xbf16>, vector<128x64xbf16>, vector<4x64xf32> -> vector<4x64xf32>
    %c5_67 = arith.constant 5 : index
    %c0_68 = arith.constant 0 : index
    %105 = vector.load %arg7[%c5_67, %c0_68] : memref<8x256xf32, #tpu.memory_space<vmem>>, vector<1x64xf32>
    %106 = vector.broadcast %105 : vector<1x64xf32> to vector<4x64xf32>
    %107 = arith.addf %104, %106 : vector<4x64xf32>
    %cst_69 = arith.constant 0.000000e+00 : f32
    %108 = vector.broadcast %cst_69 : f32 to vector<4x64xf32>
    %109 = arith.cmpf ogt, %107, %108 : vector<4x64xf32>
    %cst_70 = arith.constant 1.000000e-01 : f32
    %110 = vector.broadcast %cst_70 : f32 to vector<4x64xf32>
    %111 = arith.mulf %110, %107 : vector<4x64xf32>
    %112 = arith.select %109, %107, %111 : vector<4x64xi1>, vector<4x64xf32>
    %c2_71 = arith.constant 2 : index
    %c0_72 = arith.constant 0 : index
    %c0_73 = arith.constant 0 : index
    %113 = vector.load %arg6[%c2_71, %c0_72, %c0_73] : memref<4x256x128xbf16, #tpu.memory_space<vmem>>, vector<1x256x128xbf16>
    %114 = vector.shape_cast %113 : vector<1x256x128xbf16> to vector<256x128xbf16>
    %115 = vector.extract_strided_slice %114 {offsets = [0, 0], sizes = [64, 32], strides = [1, 1]} : vector<256x128xbf16> to vector<64x32xbf16>
    %116 = arith.truncf %112 : vector<4x64xf32> to vector<4x64xbf16>
    %cst_74 = arith.constant dense<0.000000e+00> : vector<4x32xf32>
    %117 = tpu.matmul %116, %115, %cst_74 {dimension_numbers = #tpu.dot_dimension_numbers<[1], [0], [0], [1], [0, 0, 1, 1], [], []>} : vector<4x64xbf16>, vector<64x32xbf16>, vector<4x32xf32> -> vector<4x32xf32>
    %c6_75 = arith.constant 6 : index
    %c0_76 = arith.constant 0 : index
    %118 = vector.load %arg7[%c6_75, %c0_76] : memref<8x256xf32, #tpu.memory_space<vmem>>, vector<1x32xf32>
    %119 = vector.broadcast %118 : vector<1x32xf32> to vector<4x32xf32>
    %120 = arith.addf %117, %119 : vector<4x32xf32>
    %cst_77 = arith.constant 0.000000e+00 : f32
    %121 = vector.broadcast %cst_77 : f32 to vector<4x32xf32>
    %122 = arith.cmpf ogt, %120, %121 : vector<4x32xf32>
    %cst_78 = arith.constant 1.000000e-01 : f32
    %123 = vector.broadcast %cst_78 : f32 to vector<4x32xf32>
    %124 = arith.mulf %123, %120 : vector<4x32xf32>
    %125 = arith.select %122, %120, %124 : vector<4x32xi1>, vector<4x32xf32>
    %c3_79 = arith.constant 3 : index
    %c0_80 = arith.constant 0 : index
    %c0_81 = arith.constant 0 : index
    %126 = vector.load %arg6[%c3_79, %c0_80, %c0_81] : memref<4x256x128xbf16, #tpu.memory_space<vmem>>, vector<1x256x128xbf16>
    %127 = vector.shape_cast %126 : vector<1x256x128xbf16> to vector<256x128xbf16>
    %128 = vector.extract_strided_slice %127 {offsets = [0, 0], sizes = [32, 1], strides = [1, 1]} : vector<256x128xbf16> to vector<32x1xbf16>
    %129 = arith.truncf %125 : vector<4x32xf32> to vector<4x32xbf16>
    %cst_82 = arith.constant dense<0.000000e+00> : vector<4x1xf32>
    %130 = tpu.matmul %129, %128, %cst_82 {dimension_numbers = #tpu.dot_dimension_numbers<[1], [0], [0], [1], [0, 0, 1, 1], [], []>} : vector<4x32xbf16>, vector<32x1xbf16>, vector<4x1xf32> -> vector<4x1xf32>
    %c7_83 = arith.constant 7 : index
    %c0_84 = arith.constant 0 : index
    %131 = vector.load %arg7[%c7_83, %c0_84] : memref<8x256xf32, #tpu.memory_space<vmem>>, vector<1x1xf32>
    %132 = vector.broadcast %131 : vector<1x1xf32> to vector<4x1xf32>
    %133 = arith.addf %130, %132 : vector<4x1xf32>
    %c0_85 = arith.constant 0 : index
    %c0_86 = arith.constant 0 : index
    %134 = vector.load %arg8[%c0_85, %c0_86] : memref<4x1xf32, #tpu.memory_space<vmem>>, vector<4x1xf32>
    tpu.vector_store %arg8[%c0_85, %c0_86], %133 {strides = array<i32>} : memref<4x1xf32, #tpu.memory_space<vmem>>, vector<4x1xf32>,
    return
  }
}

</mosaic_0001>

<bundles_post_ra>
// kernel: latnet_forward.1
= control target key start
LH: loop header
LB: loop body
LE: loop exit
PB: predicated region body
PF: predicated region fallthrough
CT: control target
= control target key end

     0   :  { %13 = vsyncpa [#allocation3], 0  ;;  %s3253_s0 = inlined_call_operand.vmem [shape: bf16[32,32], index: 0, kind: input, shape index: {}]   ;;  %s3254_s1 = inlined_call_operand.vmem [shape: bf16[32,16], index: 1, kind: input, shape index: {}]   ;;  %s3255_s2 = inlined_call_operand.vmem [shape: bf16[16,128], index: 2, kind: input, shape index: {}]   ;;  %s3256_s3 = inlined_call_operand.vmem [shape: bf16[128,256], index: 3, kind: input, shape index: {}]   ;;  %s3257_s4 = inlined_call_operand.vmem [shape: bf16[256,128], index: 4, kind: input, shape index: {}]   ;;  %s3258_s5 = inlined_call_operand.hbm [shape: bf16[8,128,256], index: 5, kind: input, shape index: {}]   ;;  %s3259_s6 = inlined_call_operand.hbm [shape: bf16[4,256,128], index: 6, kind: input, shape index: {}]   ;;  %s3260_s7 = inlined_call_operand.vmem [shape: f32[8,256], index: 7, kind: input, shape index: {}]   ;;  %s3261_s8 = inlined_call_operand.vmem [shape: f32[4,1], index: 8, kind: output, shape index: {}]  }
   0x1   :  { %14 = vsyncpa [#allocation5], 0  ;;  %s2964_s27 = smov [#allocation2]   ;;  %s2916_s9 = scalar_lea.hbm %s3258_s5, 16384 }
   0x2   :  { %s30_s28 = sshll.u32 %s2964_s27, 4  ;;  %p2917_p0 = scmp.ne.s32.totalorder %s3258_s5, %s2916_s9  ;;  %s31_s28 = int_to_ptr.vmem [resolvable:$true] %s30_s28 }
   0x3   :  { %p2920_p1 = scmp.lt.u32.totalorder %s2916_s9, %s3258_s5 }
   0x5   :  { %p2922_p2 = pnand %p2920_p1, %p2917_p0 }
   0x7   :  { %2925 = shalt.err (!%p2922_p2)
}
   0x8   :  { %s2926_s14 = scalar_lea.vmem %s31_s28, 16384  ;;  %p2931_p4 = scmp.lt.s32.totalorder %s31_s28, %s31_s28 }
   0x9   :  { %p2927_p3 = scmp.ne.s32.totalorder %s31_s28, %s2926_s14  ;;  %p2932_p5 = scmp.lt.s32.totalorder %s2926_s14, %s2926_s14 }
   0xb   :  { %p2933_p6 = por %p2932_p5, %p2931_p4 }
   0xd   :  { %p2934_p7 = pnand %p2933_p6, %p2927_p3 }
   0xf   :  { %2937 = shalt.err (!%p2934_p7)
}
  0x10   :  { %s2965_s15 = smov 128   ;;  %s2966_s16 = smov 8  }
  0x11   :  { %36 = dma.hbm_to_vmem [thread:$0]  %s3258_s5, 16384, %s31_s28, [#allocation3], %s2965_s15, %s2965_s15, %s2966_s16  }
  0x12   :  { %s2967_s19 = smov [#allocation4]   ;;  %s2938_s23 = scalar_lea.hbm %s3259_s6, 8192 }
  0x13   :  { %s42_s20 = sshll.u32 %s2967_s19, 4  ;;  %p2939_p8 = scmp.ne.s32.totalorder %s3259_s6, %s2938_s23  ;;  %s43_s20 = int_to_ptr.vmem [resolvable:$true] %s42_s20 }
  0x14   :  { %p2942_p9 = scmp.lt.u32.totalorder %s2938_s23, %s3259_s6 }
  0x16   :  { %p2944_p10 = pnand %p2942_p9, %p2939_p8 }
  0x18   :  { %2947 = shalt.err (!%p2944_p10)
}
  0x19   :  { %s2948_s29 = scalar_lea.vmem %s43_s20, 8192  ;;  %p2953_p12 = scmp.lt.s32.totalorder %s43_s20, %s43_s20 }
  0x1a   :  { %p2949_p11 = scmp.ne.s32.totalorder %s43_s20, %s2948_s29  ;;  %p2954_p13 = scmp.lt.s32.totalorder %s2948_s29, %s2948_s29 }
  0x1c   :  { %p2955_p0 = por %p2954_p13, %p2953_p12 }
  0x1e   :  { %p2956_p1 = pnand %p2955_p0, %p2949_p11 }
  0x20   :  { %2959 = shalt.err (!%p2956_p1)
}
  0x21   :  { %s2968_s5 = smov 64   ;;  %s2969_s28 = smov 4  }
  0x22   :  { %48 = dma.hbm_to_vmem [thread:$0]  %s3259_s6, 8192, %s43_s20, [#allocation5], %s2968_s5, %s2968_s5, %s2969_s28  }
  0x23   :  { %2960 = dma.done.wait [#allocation3], 16384  }
  0x24   :  { %2961 = vsyncadd [#allocation3], 4294950912 }
  0x25   :  { %2962 = dma.done.wait [#allocation5], 8192  }
  0x26   :  { %2963 = vsyncadd [#allocation5], 4294959104  ;;  %v2649_v0 = vld [vmem:[%s3255_s2] sm:$0xff]   ;;  %vm84_vm0 = vcmask 130048   ;;  %v2651_v2 = vld [vmem:[%s3254_s1 + $0x8] sm:$0xff]   ;;  %vm153_vm1 = vcmask 261120  }
  0x27   :  { %v2650_v1 = vld [vmem:[%s3254_s1] sm:$0xff]   ;;  %2578 = vmatprep.subr.bf16.mxu0 %v2649_v0  ;;  %v2659_v6 = vld [vmem:[%s3256_s3 + $0x14] ss:$8 sps:$4 sm:$0xff]   ;;  %v2657_v7 = vld [vmem:[%s3256_s3 + $0x10] ss:$8 sps:$4 sm:$0xff]   ;;  %v2970_v27 = vmov 0  }
  0x28   :  { %2579 = vmatpush3.bf16.msra.mxu0 %v2649_v0  ;;  %2580 = vmatprep.mubr.msk.bf16.mxu0 %vm84_vm0, %v2650_v1  ;;  %v3054_v3 = vld [vmem:[%s3253_s0] sm:$0xff]   ;;  %v2665_v10 = vld [vmem:[%s3256_s3 + $0x34] ss:$8 sps:$4 sm:$0xff]   ;;  %v2663_v11 = vld [vmem:[%s3256_s3 + $0x30] ss:$8 sps:$4 sm:$0xff]  }
  0x29   :  { %2588 = vmatprep.mubr.msk.bf16.mxu1 %vm153_vm1, %v3054_v3  ;;  %v2654_v4 = vld [vmem:[%s3256_s3] ss:$8 sps:$4 sm:$0xff]   ;;  %v2656_v5 = vld [vmem:[%s3256_s3 + $0x4] ss:$8 sps:$4 sm:$0xff]   ;;  %v2671_v14 = vld [vmem:[%s3256_s3 + $0x54] ss:$8 sps:$4 sm:$0xff]  }
  0x2a   :  { %319 = vmatprep.subr.bf16.mxu0 %v2656_v5  ;;  %v2662_v8 = vld [vmem:[%s3256_s3 + $0x24] ss:$8 sps:$4 sm:$0xff]   ;;  %v2660_v9 = vld [vmem:[%s3256_s3 + $0x20] ss:$8 sps:$4 sm:$0xff]   ;;  %v2669_v15 = vld [vmem:[%s3256_s3 + $0x50] ss:$8 sps:$4 sm:$0xff]  }
  0x2b   :  { %2581 = vmatmul.mubr.msk.bf16.vlgmr.msra.gmra.mrb[0].mxu0 %vm84_vm0, %v2651_v2  ;;  %v2668_v12 = vld [vmem:[%s3256_s3 + $0x44] ss:$8 sps:$4 sm:$0xff]   ;;  %v2666_v13 = vld [vmem:[%s3256_s3 + $0x40] ss:$8 sps:$4 sm:$0xff]   ;;  %v2677_v25 = vld [vmem:[%s3256_s3 + $0x74] ss:$8 sps:$4 sm:$0xff]  }
  0x2c   :  { %320 = vmatpush1.bf16.msra.mxu0 %v2654_v4  ;;  %v3097_v22 = vld [vmem:[%s3253_s0 + $0x8] sm:$0xff]   ;;  %v2675_v26 = vld [vmem:[%s3256_s3 + $0x70] ss:$8 sps:$4 sm:$0xff]   ;;  %351 = vmatprep.mubr.bf16.mxu0 %v2970_v27  ;;  %v142_v28 = vld [vmem:[%s3260_s7] ss:$0 sm:$0xff] }
  0x2d   :  { %321 = vmatprep.subr.bf16.mxu0 %v2659_v6  ;;  %v2674_v23 = vld [vmem:[%s3256_s3 + $0x64] ss:$8 sps:$4 sm:$0xff]   ;;  %v2672_v24 = vld [vmem:[%s3256_s3 + $0x60] ss:$8 sps:$4 sm:$0xff]   ;;  %v2682_v63 = vld [vmem:[%s3257_s4 + $0x50] sm:$0xff]  }
  0x2e   :  { %v2678_v59 = vld [vmem:[%s3257_s4 + $0x40] sm:$0xff]   ;;  %v2680_v61 = vld [vmem:[%s3257_s4 + $0x48] sm:$0xff]   ;;  %v2683_v0 = vld [vmem:[%s3257_s4 + $0x10] sm:$0xff]  }
  0x2f   :  { %v2679_v60 = vld [vmem:[%s3257_s4] sm:$0xff]   ;;  %v2681_v62 = vld [vmem:[%s3257_s4 + $0x8] sm:$0xff]   ;;  %v2684_v1 = vld [vmem:[%s3257_s4 + $0x58] sm:$0xff]  }
  0x30   :  { %322 = vmatpush1.bf16.msra.mxu0 %v2657_v7  ;;  %v2685_v2 = vld [vmem:[%s3257_s4 + $0x18] sm:$0xff]   ;;  %v2687_v4 = vld [vmem:[%s3257_s4 + $0x20] sm:$0xff]   ;;  %v2688_v5 = vld [vmem:[%s3257_s4 + $0x68] sm:$0xff]  }
  0x31   :  { %323 = vmatprep.subr.bf16.mxu0 %v2662_v8  ;;  %v2689_v6 = vld [vmem:[%s3257_s4 + $0x28] sm:$0xff]   ;;  %v2690_v7 = vld [vmem:[%s3257_s4 + $0x70] sm:$0xff]  }
  0x32   :  { %v2691_v8 = vld [vmem:[%s3257_s4 + $0x30] sm:$0xff]  }
  0x34   :  { %324 = vmatpush1.bf16.msra.mxu0 %v2660_v9  ;;  %v2692_v9 = vld [vmem:[%s3257_s4 + $0x78] sm:$0xff]  }
  0x35   :  { %325 = vmatprep.subr.bf16.mxu0 %v2665_v10  ;;  %v2693_v10 = vld [vmem:[%s3257_s4 + $0x38] sm:$0xff]  }
  0x38   :  { %326 = vmatpush1.bf16.msra.mxu0 %v2663_v11  ;;  %v379_v11 = vlaneseq }
  0x39   :  { %327 = vmatprep.subr.bf16.mxu0 %v2668_v12 }
  0x3a   :  { %v3174_v12 = vshrl.u32 %v379_v11, 7 }
  0x3c   :  { %328 = vmatpush1.bf16.msra.mxu0 %v2666_v13  ;;  %v381_v13 = vsub.s32 0, %v3174_v12 }
  0x3d   :  { %329 = vmatprep.subr.bf16.mxu0 %v2671_v14  ;;  %v2318_v14 = vld [vmem:[%s3260_s7 + $0x1] ss:$8 sm:$0x3] }
  0x40   :  { %330 = vmatpush1.bf16.msra.mxu0 %v2669_v15  ;;  %v385_v15 = vsub.s32 1, %v3174_v12  ;;  %v2908_v12 = vld [vmem:[#allocation4 + $0xb0] sm:$0xff]  }
  0x41   :  { %331 = vmatprep.subr.bf16.mxu0 %v2674_v23 }
  0x44   :  { %332 = vmatpush1.bf16.msra.mxu0 %v2672_v24 }
  0x45   :  { %333 = vmatprep.subr.bf16.mxu0 %v2677_v25 }
  0x48   :  { %334 = vmatpush1.bf16.msra.mxu0 %v2675_v26 }
  0xfe   :  { %v2582_v16 = vpop.f32.mrb[0].mxu0 }
  0xff   :  { %v125_v17 = vpop.f32.mrb[1].mxu0 }
 0x100   :  { %v2583_v18 = vpop.f32.mrb[2].mxu0 }
 0x101   :  { %v141_v19 = vpack.c.bf16 %v2583_v18, %v2582_v16  ;;  %v128_v20 = vpop.f32.mrb[3].mxu0  ;;  %v382_v16 = vrot.slane %v2318_v14, %v381_v13 }
 0x102   :  { %v140_v21 = vpack.c.bf16 %v128_v20, %v125_v17  ;;  %v386_v17 = vrot.slane %v2318_v14, %v385_v15 }
 0x104   :  { %2584 = vmatprep.subr.bf16.mxu1 %v140_v21 }
 0x105   :  { %2585 = vmatpush3.bf16.msra.mxu1 %v140_v21 }
 0x106   :  { %2586 = vmatprep.subr.bf16.mxu1 %v141_v19 }
 0x109   :  { %2587 = vmatpush3.bf16.msra.mxu1 %v141_v19 }
 0x10c   :  { %2589 = vmatmul.mubr.msk.bf16.vlgmr.msra.gmra.mrb[0].mxu1 %vm153_vm1, %v3097_v22 }
 0x10d   :  { %421 = vmatprep.mubr.bf16.mxu1 %v2970_v27 }
 0x1df   :  { %v2590_v29 = vpop.f32.mrb[0].mxu1 }
 0x1e0   :  { %v203_v30 = vadd.f32 %v2590_v29, %v142_v28  ;;  %v194_v31 = vpop.f32.mrb[1].mxu1 }
 0x1e1   :  { %v195_v32 = vadd.f32 %v194_v31, %v142_v28  ;;  %v2591_v33 = vpop.f32.mrb[2].mxu1 }
 0x1e2   :  { %v215_v34 = vmul.f32 0.1, %v203_v30  ;;  %v206_v35 = vadd.f32 %v2591_v33, %v142_v28  ;;  %v197_v36 = vpop.f32.mrb[3].mxu1  ;;  %vm211_vm2 = vcmp.gt.f32.partialorder %v203_v30, 0.0 }
 0x1e3   :  { %v213_v37 = vmul.f32 0.1, %v195_v32  ;;  %v198_v38 = vadd.f32 %v197_v36, %v142_v28  ;;  %vm209_vm3 = vcmp.gt.f32.partialorder %v195_v32, 0.0 }
 0x1e4   :  { %vm212_vm4 = vcmp.gt.f32.partialorder %v206_v35, 0.0  ;;  %v216_v39 = vmul.f32 0.1, %v206_v35  ;;  %v219_v41 = vsel %vm211_vm2, %v203_v30, %v215_v34 }
 0x1e5   :  { %vm210_vm5 = vcmp.gt.f32.partialorder %v198_v38, 0.0  ;;  %v214_v40 = vmul.f32 0.1, %v198_v38  ;;  %v217_v43 = vsel %vm209_vm3, %v195_v32, %v213_v37 }
 0x1e6   :  { %v220_v42 = vsel %vm212_vm4, %v206_v35, %v216_v39 }
 0x1e7   :  { %v218_v44 = vsel %vm210_vm5, %v198_v38, %v214_v40  ;;  %v222_v45 = vpack.c.bf16 %v220_v42, %v219_v41  ;;  %vm2972_vm5 = vmmov 0  }
 0x1e8   :  { %v221_v46 = vpack.c.bf16 %v218_v44, %v217_v43 }
 0x1ea   :  { %352 = vmatmul.mubr.bf16.vlgmr.msra.gmra.mrb[4].mxu0 %v221_v46 }
 0x1eb   :  { %361 = vmatprep.mubr.bf16.mxu0 %v2970_v27 }
 0x1f2   :  { %362 = vmatmul.mubr.bf16.gmra.mrb[8].mxu0 %v222_v45 }
 0x1f3   :  { %2596 = vmatprep.mubr.msk.bf16.mxu0 %vm153_vm1, %v3054_v3 }
 0x2bd   :  { %v353_v47 = vpop.f32.mrb[4].mxu0 }
 0x2be   :  { %v355_v48 = vpop.f32.mrb[5].mxu0 }
 0x2bf   :  { %v357_v49 = vpop.f32.mrb[6].mxu0 }
 0x2c0   :  { %v372_v50 = vpack.c.bf16 %v357_v49, %v353_v47  ;;  %v359_v51 = vpop.f32.mrb[7].mxu0 }
 0x2c1   :  { %v373_v52 = vpack.c.bf16 %v359_v51, %v355_v48 }
 0x2c3   :  { %389 = vmatprep.subr.bf16.mxu1 %v373_v52 }
 0x2c4   :  { %390 = vmatpush1.bf16.msra.mxu1 %v372_v50 }
 0x2c5   :  { %v363_v53 = vpop.f32.mrb[8].mxu0 }
 0x2c6   :  { %v365_v54 = vpop.f32.mrb[9].mxu0 }
 0x2c7   :  { %v367_v55 = vpop.f32.mrb[10].mxu0 }
 0x2c8   :  { %v374_v56 = vpack.c.bf16 %v367_v55, %v363_v53  ;;  %v369_v57 = vpop.f32.mrb[11].mxu0 }
 0x2c9   :  { %v375_v58 = vpack.c.bf16 %v369_v57, %v365_v54  ;;  %v2696_v57 = vld [vmem:[#allocation2 + $0x84] ss:$8 sps:$4 sm:$0xff]  }
 0x2cb   :  { %391 = vmatprep.subr.bf16.mxu1 %v375_v58  ;;  %v2702_v58 = vld [vmem:[#allocation2 + $0x94] ss:$8 sps:$4 sm:$0xff]  }
 0x2cc   :  { %392 = vmatpush1.bf16.msra.mxu1 %v374_v56  ;;  %v2694_v56 = vld [vmem:[#allocation2 + $0x80] ss:$8 sps:$4 sm:$0xff]  }
 0x2cd   :  { %2507 = vmatprep.subr.bf16.mxu1 %v2678_v59  ;;  %v2700_v59 = vld [vmem:[#allocation2 + $0x90] ss:$8 sps:$4 sm:$0xff]  }
 0x2cf   :  { %2319 = vmatmul.mubr.msk.bf16.vlgmr.msra.gmra.mrb[4].mxu1 %vm153_vm1, %v3054_v3  ;;  %v2686_v3 = vld [vmem:[%s3257_s4 + $0x60] sm:$0xff]  }
 0x2d0   :  { %431 = vmatprep.mubr.bf16.mxu1 %v2970_v27  ;;  %2508 = vmatpush3.bf16.msra.mxu1 %v2679_v60  ;;  %v2708_v60 = vld [vmem:[#allocation2 + $0xa4] ss:$8 sps:$4 sm:$0xff]  }
 0x2d1   :  { %2509 = vmatprep.subr.bf16.mxu1 %v2680_v61  ;;  %v2706_v61 = vld [vmem:[#allocation2 + $0xa0] ss:$8 sps:$4 sm:$0xff]  }
 0x2d4   :  { %2510 = vmatpush3.bf16.msra.mxu1 %v2681_v62  ;;  %v2714_v62 = vld [vmem:[#allocation2 + $0xb4] ss:$8 sps:$4 sm:$0xff]  }
 0x2d5   :  { %2511 = vmatprep.subr.bf16.mxu1 %v2682_v63  ;;  %v2712_v63 = vld [vmem:[#allocation2 + $0xb0] ss:$8 sps:$4 sm:$0xff]  }
 0x2d7   :  { %2320 = vmatmul.mubr.msk.bf16.gmra.mrb[8].mxu1 %vm153_vm1, %v3097_v22 }
 0x2d8   :  { %2512 = vmatpush3.bf16.msra.mxu1 %v2683_v0  ;;  %v2720_v0 = vld [vmem:[#allocation2 + $0xc4] ss:$8 sps:$4 sm:$0xff]  }
 0x2d9   :  { %2513 = vmatprep.subr.bf16.mxu1 %v2684_v1  ;;  %v2718_v1 = vld [vmem:[#allocation2 + $0xc0] ss:$8 sps:$4 sm:$0xff]  }
 0x2dc   :  { %2514 = vmatpush3.bf16.msra.mxu1 %v2685_v2 }
 0x2dd   :  { %2515 = vmatprep.subr.bf16.mxu1 %v2686_v3 }
 0x2e0   :  { %2516 = vmatpush3.bf16.msra.mxu1 %v2687_v4 }
 0x2e1   :  { %2517 = vmatprep.subr.bf16.mxu1 %v2688_v5 }
 0x2e4   :  { %2518 = vmatpush3.bf16.msra.mxu1 %v2689_v6 }
 0x2e5   :  { %2519 = vmatprep.subr.bf16.mxu1 %v2690_v7 }
 0x2e8   :  { %2520 = vmatpush3.bf16.msra.mxu1 %v2691_v8 }
 0x2e9   :  { %2521 = vmatprep.subr.bf16.mxu1 %v2692_v9 }
 0x2ec   :  { %2522 = vmatpush3.bf16.msra.mxu1 %v2693_v10 }
 0x2ed   :  { %829 = vmatprep.subr.bf16.mxu1 %v2696_v57 }
 0x3a2   :  { %v423_v18 = vpop.f32.mrb[4].mxu1 }
 0x3a3   :  { %v424_v19 = vadd.f32 %v423_v18, %v382_v16  ;;  %v425_v20 = vpop.f32.mrb[5].mxu1 }
 0x3a4   :  { %v426_v21 = vadd.f32 %v425_v20, %v386_v17  ;;  %v427_v23 = vpop.f32.mrb[6].mxu1  ;;  %v2697_v20 = vld [vmem:[#allocation2 + $0x180] ss:$8 sps:$4 sm:$0xff]  }
 0x3a5   :  { %v450_v24 = vmul.f32 0.1, %v424_v19  ;;  %v428_v25 = vadd.f32 %v427_v23, %v382_v16  ;;  %v429_v26 = vpop.f32.mrb[7].mxu1  ;;  %vm442_vm6 = vcmp.gt.f32.partialorder %v424_v19, 0.0  ;;  %v2703_v23 = vld [vmem:[#allocation2 + $0x190] ss:$8 sps:$4 sm:$0xff]  }
 0x3a6   :  { %v451_v28 = vmul.f32 0.1, %v426_v21  ;;  %v430_v29 = vadd.f32 %v429_v26, %v386_v17  ;;  %vm443_vm7 = vcmp.gt.f32.partialorder %v426_v21, 0.0  ;;  %v2717_v26 = vld [vmem:[#allocation2 + $0x1b4] ss:$8 sps:$4 sm:$0xff]  }
 0x3a7   :  { %vm444_vm8 = vcmp.gt.f32.partialorder %v428_v25, 0.0  ;;  %v452_v30 = vmul.f32 0.1, %v428_v25  ;;  %v458_v32 = vsel %vm442_vm6, %v424_v19, %v450_v24  ;;  %v2699_v19 = vld [vmem:[#allocation2 + $0x184] ss:$8 sps:$4 sm:$0xff]  }
 0x3a8   :  { %vm445_vm9 = vcmp.gt.f32.partialorder %v430_v29, 0.0  ;;  %v453_v31 = vmul.f32 0.1, %v430_v29  ;;  %v459_v36 = vsel %vm443_vm7, %v426_v21, %v451_v28  ;;  %v2705_v21 = vld [vmem:[#allocation2 + $0x194] ss:$8 sps:$4 sm:$0xff]  }
 0x3a9   :  { %v460_v33 = vsel %vm444_vm8, %v428_v25, %v452_v30  ;;  %v2711_v24 = vld [vmem:[#allocation2 + $0x1a4] ss:$8 sps:$4 sm:$0xff]   ;;  %v2709_v25 = vld [vmem:[#allocation2 + $0x1a0] ss:$8 sps:$4 sm:$0xff]   ;;  %v2715_v28 = vld [vmem:[#allocation2 + $0x1b0] ss:$8 sps:$4 sm:$0xff]  }
 0x3aa   :  { %v466_v34 = vpack.c.bf16 %v460_v33, %v458_v32  ;;  %v433_v35 = vpop.f32.mrb[8].mxu1  ;;  %v461_v37 = vsel %vm445_vm9, %v430_v29, %v453_v31  ;;  %v2723_v29 = vld [vmem:[#allocation2 + $0x1c4] ss:$8 sps:$4 sm:$0xff]   ;;  %v2721_v30 = vld [vmem:[#allocation2 + $0x1c0] ss:$8 sps:$4 sm:$0xff]   ;;  %vm2176_vm8 = vcmask 523264  }
 0x3ab   :  { %v434_v38 = vadd.f32 %v433_v35, %v382_v16  ;;  %v435_v39 = vpop.f32.mrb[9].mxu1  ;;  %v467_v40 = vpack.c.bf16 %v461_v37, %v459_v36  ;;  %v2726_v31 = vld [vmem:[#allocation2 + $0xd4] ss:$8 sps:$4 sm:$0xff]   ;;  %v2724_v32 = vld [vmem:[#allocation2 + $0xd0] ss:$8 sps:$4 sm:$0xff]  }
 0x3ac   :  { %v436_v41 = vadd.f32 %v435_v39, %v386_v17  ;;  %v437_v42 = vpop.f32.mrb[10].mxu1  ;;  %v2727_v33 = vld [vmem:[#allocation2 + $0x1d0] ss:$8 sps:$4 sm:$0xff]   ;;  %v2735_v35 = vld [vmem:[#allocation2 + $0x1e4] ss:$8 sps:$4 sm:$0xff]  }
 0x3ad   :  { %v454_v43 = vmul.f32 0.1, %v434_v38  ;;  %v438_v44 = vadd.f32 %v437_v42, %v382_v16  ;;  %v439_v45 = vpop.f32.mrb[11].mxu1  ;;  %630 = vmatprep.mubr.bf16.mxu1 %v467_v40  ;;  %vm446_vm10 = vcmp.gt.f32.partialorder %v434_v38, 0.0  ;;  %v2730_v36 = vld [vmem:[#allocation2 + $0xe0] ss:$8 sps:$4 sm:$0xff]  }
 0x3ae   :  { %v455_v46 = vmul.f32 0.1, %v436_v41  ;;  %v440_v47 = vadd.f32 %v439_v45, %v386_v17  ;;  %631 = vmatmul.mubr.bf16.vlgmr.msra.gmra.mrb[12].mxu1 %v466_v34  ;;  %vm447_vm11 = vcmp.gt.f32.partialorder %v436_v41, 0.0  ;;  %v2732_v34 = vld [vmem:[#allocation2 + $0xe4] ss:$8 sps:$4 sm:$0xff]  }
 0x3af   :  { %vm448_vm12 = vcmp.gt.f32.partialorder %v438_v44, 0.0  ;;  %v456_v48 = vmul.f32 0.1, %v438_v44  ;;  %v462_v50 = vsel %vm446_vm10, %v434_v38, %v454_v43  ;;  %830 = vmatpush1.bf16.msra.mxu1 %v2694_v56  ;;  %v2733_v37 = vld [vmem:[#allocation2 + $0x1e0] ss:$8 sps:$4 sm:$0xff]   ;;  %vm2285_vm10 = vcmask 3072  }
 0x3b0   :  { %vm449_vm13 = vcmp.gt.f32.partialorder %v440_v47, 0.0  ;;  %v457_v49 = vmul.f32 0.1, %v440_v47  ;;  %v463_v52 = vsel %vm447_vm11, %v436_v41, %v455_v46  ;;  %831 = vmatprep.subr.bf16.mxu1 %v2702_v58  ;;  %v2738_v38 = vld [vmem:[#allocation2 + $0xf4] ss:$8 sps:$4 sm:$0xff]  }
 0x3b1   :  { %v464_v51 = vsel %vm448_vm12, %v438_v44, %v456_v48  ;;  %v2741_v39 = vld [vmem:[#allocation2 + $0x1f4] ss:$8 sps:$4 sm:$0xff]   ;;  %v2736_v40 = vld [vmem:[#allocation2 + $0xf0] ss:$8 sps:$4 sm:$0xff]   ;;  %v2744_v42 = vld [vmem:[#allocation2 + $0x284] ss:$8 sps:$4 sm:$0xff]  }
 0x3b2   :  { %v465_v53 = vsel %vm449_vm13, %v440_v47, %v457_v49  ;;  %v468_v54 = vpack.c.bf16 %v464_v51, %v462_v50  ;;  %v2739_v41 = vld [vmem:[#allocation2 + $0x1f0] ss:$8 sps:$4 sm:$0xff]   ;;  %v2747_v43 = vld [vmem:[#allocation2 + $0x384] ss:$8 sps:$4 sm:$0xff]   ;;  %v649_v44 = vld [vmem:[%s3260_s7 + $0x2] ss:$0 sm:$0xff] }
 0x3b3   :  { %v469_v55 = vpack.c.bf16 %v465_v53, %v463_v52  ;;  %832 = vmatpush1.bf16.msra.mxu1 %v2700_v59 }
 0x3b4   :  { %833 = vmatprep.subr.bf16.mxu1 %v2708_v60 }
 0x3b5   :  { %638 = vmatprep.mubr.bf16.mxu1 %v469_v55 }
 0x3b6   :  { %639 = vmatmul.mubr.bf16.gmra.mrb[16].mxu1 %v468_v54 }
 0x3b7   :  { %861 = vmatprep.mubr.bf16.mxu1 %v2970_v27  ;;  %834 = vmatpush1.bf16.msra.mxu1 %v2706_v61 }
 0x3b8   :  { %835 = vmatprep.subr.bf16.mxu1 %v2714_v62 }
 0x3bb   :  { %836 = vmatpush1.bf16.msra.mxu1 %v2712_v63  ;;  %v2742_v63 = vld [vmem:[#allocation2 + $0x280] ss:$8 sps:$4 sm:$0xff]  }
 0x3bc   :  { %837 = vmatprep.subr.bf16.mxu1 %v2720_v0  ;;  %v2745_v0 = vld [vmem:[#allocation2 + $0x380] ss:$8 sps:$4 sm:$0xff]  }
 0x3bf   :  { %838 = vmatpush1.bf16.msra.mxu1 %v2718_v1 }
 0x3c0   :  { %839 = vmatprep.subr.bf16.mxu1 %v2726_v31  ;;  %v2781_v31 = vld [vmem:[#allocation2 + $0x3e0] ss:$8 sps:$4 sm:$0xff]  }
 0x3c3   :  { %840 = vmatpush1.bf16.msra.mxu1 %v2724_v32  ;;  %v2789_v32 = vld [vmem:[#allocation2 + $0x3f4] ss:$8 sps:$4 sm:$0xff]  }
 0x3c4   :  { %841 = vmatprep.subr.bf16.mxu1 %v2732_v34  ;;  %v2787_v34 = vld [vmem:[#allocation2 + $0x3f0] ss:$8 sps:$4 sm:$0xff]  }
 0x3c7   :  { %842 = vmatpush1.bf16.msra.mxu1 %v2730_v36  ;;  %v2795_v36 = vld [vmem:[#allocation2 + $0x104] ss:$8 sps:$4 sm:$0xff]  }
 0x3c8   :  { %843 = vmatprep.subr.bf16.mxu1 %v2738_v38  ;;  %v2793_v38 = vld [vmem:[#allocation2 + $0x100] ss:$8 sps:$4 sm:$0xff]  }
 0x3cb   :  { %844 = vmatpush1.bf16.msra.mxu1 %v2736_v40 }
 0x3cc   :  { %1144 = vmatprep.subr.bf16.mxu1 %v2744_v42  ;;  %v2801_v42 = vld [vmem:[#allocation2 + $0x114] ss:$8 sps:$4 sm:$0xff]  }
 0x481   :  { %v2523_v2 = vpop.f32.mrb[12].mxu1 }
 0x482   :  { %v2524_v3 = vpop.f32.mrb[13].mxu1 }
 0x483   :  { %v2525_v4 = vadd.f32 %v2524_v3, %v2523_v2  ;;  %v2526_v5 = vpop.f32.mrb[14].mxu1  ;;  %v2750_v3 = vld [vmem:[#allocation2 + $0x294] ss:$8 sps:$4 sm:$0xff]  }
 0x484   :  { %v2527_v6 = vpop.f32.mrb[15].mxu1 }
 0x485   :  { %v2528_v7 = vadd.f32 %v2527_v6, %v2526_v5  ;;  %v2748_v5 = vld [vmem:[#allocation2 + $0x290] ss:$8 sps:$4 sm:$0xff]  }
 0x486   :  { %v2751_v6 = vld [vmem:[#allocation2 + $0x390] ss:$8 sps:$4 sm:$0xff]  }
 0x487   :  { %v647_v8 = vpack.c.bf16 %v2528_v7, %v2525_v4  ;;  %v2753_v4 = vld [vmem:[#allocation2 + $0x394] ss:$8 sps:$4 sm:$0xff]   ;;  %v2756_v7 = vld [vmem:[#allocation2 + $0x2a4] ss:$8 sps:$4 sm:$0xff]  }
 0x489   :  { %v2529_v9 = vpop.f32.mrb[16].mxu1  ;;  %2592 = vmatprep.subr.bf16.mxu0 %v647_v8 }
 0x48a   :  { %v2530_v10 = vpop.f32.mrb[17].mxu1  ;;  %2593 = vmatpush3.bf16.msra.mxu0 %v647_v8  ;;  %v2759_v8 = vld [vmem:[#allocation2 + $0x3a4] ss:$8 sps:$4 sm:$0xff]  }
 0x48b   :  { %v2531_v11 = vadd.f32 %v2530_v10, %v2529_v9  ;;  %v2532_v14 = vpop.f32.mrb[18].mxu1  ;;  %v2754_v9 = vld [vmem:[#allocation2 + $0x2a0] ss:$8 sps:$4 sm:$0xff]  }
 0x48c   :  { %v2533_v16 = vpop.f32.mrb[19].mxu1  ;;  %v2757_v10 = vld [vmem:[#allocation2 + $0x3a0] ss:$8 sps:$4 sm:$0xff]  }
 0x48d   :  { %v2534_v17 = vadd.f32 %v2533_v16, %v2532_v14  ;;  %v2765_v14 = vld [vmem:[#allocation2 + $0x3b4] ss:$8 sps:$4 sm:$0xff]   ;;  %v2760_v16 = vld [vmem:[#allocation2 + $0x2b0] ss:$8 sps:$4 sm:$0xff]  }
 0x48f   :  { %v648_v18 = vpack.c.bf16 %v2534_v17, %v2531_v11  ;;  %v2762_v11 = vld [vmem:[#allocation2 + $0x2b4] ss:$8 sps:$4 sm:$0xff]   ;;  %v2763_v17 = vld [vmem:[#allocation2 + $0x3b0] ss:$8 sps:$4 sm:$0xff]  }
 0x491   :  { %2594 = vmatprep.subr.bf16.mxu0 %v648_v18 }
 0x492   :  { %2595 = vmatpush3.bf16.msra.mxu0 %v648_v18  ;;  %v2768_v18 = vld [vmem:[#allocation2 + $0x2c4] ss:$8 sps:$4 sm:$0xff]  }
 0x493   :  { %986 = vmatprep.subr.bf16.mxu0 %v2699_v19  ;;  %v2771_v19 = vld [vmem:[#allocation2 + $0x3c4] ss:$8 sps:$4 sm:$0xff]  }
 0x495   :  { %2597 = vmatmul.mubr.msk.bf16.vlgmr.msra.gmra.mrb[12].mxu0 %vm153_vm1, %v3097_v22  ;;  %v2729_v22 = vld [vmem:[#allocation2 + $0x1d4] ss:$8 sps:$4 sm:$0xff]  }
 0x496   :  { %987 = vmatpush1.bf16.msra.mxu0 %v2697_v20  ;;  %1018 = vmatprep.mubr.bf16.mxu0 %v2970_v27  ;;  %v2766_v20 = vld [vmem:[#allocation2 + $0x2c0] ss:$8 sps:$4 sm:$0xff]  }
 0x497   :  { %988 = vmatprep.subr.bf16.mxu0 %v2705_v21  ;;  %v2769_v21 = vld [vmem:[#allocation2 + $0x3c0] ss:$8 sps:$4 sm:$0xff]  }
 0x49a   :  { %989 = vmatpush1.bf16.msra.mxu0 %v2703_v23  ;;  %v2774_v23 = vld [vmem:[#allocation2 + $0x2d4] ss:$8 sps:$4 sm:$0xff]  }
 0x49b   :  { %990 = vmatprep.subr.bf16.mxu0 %v2711_v24  ;;  %v2777_v24 = vld [vmem:[#allocation2 + $0x3d4] ss:$8 sps:$4 sm:$0xff]  }
 0x49e   :  { %991 = vmatpush1.bf16.msra.mxu0 %v2709_v25  ;;  %v2772_v25 = vld [vmem:[#allocation2 + $0x2d0] ss:$8 sps:$4 sm:$0xff]  }
 0x49f   :  { %992 = vmatprep.subr.bf16.mxu0 %v2717_v26  ;;  %v2775_v26 = vld [vmem:[#allocation2 + $0x3d0] ss:$8 sps:$4 sm:$0xff]  }
 0x4a2   :  { %993 = vmatpush1.bf16.msra.mxu0 %v2715_v28  ;;  %v2780_v28 = vld [vmem:[#allocation2 + $0x2e4] ss:$8 sps:$4 sm:$0xff]  }
 0x4a3   :  { %994 = vmatprep.subr.bf16.mxu0 %v2723_v29  ;;  %v2783_v29 = vld [vmem:[#allocation2 + $0x3e4] ss:$8 sps:$4 sm:$0xff]  }
 0x4a6   :  { %995 = vmatpush1.bf16.msra.mxu0 %v2721_v30  ;;  %v2778_v30 = vld [vmem:[#allocation2 + $0x2e0] ss:$8 sps:$4 sm:$0xff]  }
 0x4a7   :  { %996 = vmatprep.subr.bf16.mxu0 %v2729_v22  ;;  %v2786_v22 = vld [vmem:[#allocation2 + $0x2f4] ss:$8 sps:$4 sm:$0xff]  }
 0x4aa   :  { %997 = vmatpush1.bf16.msra.mxu0 %v2727_v33  ;;  %v2784_v33 = vld [vmem:[#allocation2 + $0x2f0] ss:$8 sps:$4 sm:$0xff]  }
 0x4ab   :  { %998 = vmatprep.subr.bf16.mxu0 %v2735_v35  ;;  %v2792_v35 = vld [vmem:[#allocation2 + $0x4] ss:$8 sps:$4 sm:$0xff]  }
 0x4ae   :  { %999 = vmatpush1.bf16.msra.mxu0 %v2733_v37  ;;  %v2790_v37 = vld [vmem:[#allocation2] ss:$8 sps:$4 sm:$0xff]  }
 0x4af   :  { %1000 = vmatprep.subr.bf16.mxu0 %v2741_v39 }
 0x4b2   :  { %1001 = vmatpush1.bf16.msra.mxu0 %v2739_v41  ;;  %v2798_v41 = vld [vmem:[#allocation2 + $0x14] ss:$8 sps:$4 sm:$0xff]  }
 0x4b3   :  { %1301 = vmatprep.subr.bf16.mxu0 %v2747_v43  ;;  %v2796_v43 = vld [vmem:[#allocation2 + $0x10] ss:$8 sps:$4 sm:$0xff]  }
 0x568   :  { %v2598_v45 = vpop.f32.mrb[12].mxu0 }
 0x569   :  { %v693_v46 = vadd.f32 %v2598_v45, %v649_v44  ;;  %v684_v47 = vpop.f32.mrb[13].mxu0  ;;  %v2804_v45 = vld [vmem:[#allocation2 + $0x24] ss:$8 sps:$4 sm:$0xff]  }
 0x56a   :  { %v685_v48 = vadd.f32 %v684_v47, %v649_v44  ;;  %v2599_v49 = vpop.f32.mrb[14].mxu0  ;;  %v2802_v47 = vld [vmem:[#allocation2 + $0x20] ss:$8 sps:$4 sm:$0xff]  }
 0x56b   :  { %v705_v50 = vmul.f32 0.1, %v693_v46  ;;  %v696_v51 = vadd.f32 %v2599_v49, %v649_v44  ;;  %v687_v52 = vpop.f32.mrb[15].mxu0  ;;  %vm701_vm14 = vcmp.gt.f32.partialorder %v693_v46, 0.0  ;;  %v2810_v49 = vld [vmem:[#allocation2 + $0x34] ss:$8 sps:$4 sm:$0xff]  }
 0x56c   :  { %v703_v53 = vmul.f32 0.1, %v685_v48  ;;  %v688_v54 = vadd.f32 %v687_v52, %v649_v44  ;;  %vm699_vm15 = vcmp.gt.f32.partialorder %v685_v48, 0.0  ;;  %v2799_v44 = vld [vmem:[#allocation2 + $0x110] ss:$8 sps:$4 sm:$0xff]  }
 0x56d   :  { %vm702_vm0 = vcmp.gt.f32.partialorder %v696_v51, 0.0  ;;  %v706_v55 = vmul.f32 0.1, %v696_v51  ;;  %v709_v57 = vsel %vm701_vm14, %v693_v46, %v705_v50  ;;  %v2807_v46 = vld [vmem:[#allocation2 + $0x124] ss:$8 sps:$4 sm:$0xff]  }
 0x56e   :  { %vm700_vm2 = vcmp.gt.f32.partialorder %v688_v54, 0.0  ;;  %v704_v56 = vmul.f32 0.1, %v688_v54  ;;  %v707_v59 = vsel %vm699_vm15, %v685_v48, %v703_v53  ;;  %v2805_v48 = vld [vmem:[#allocation2 + $0x120] ss:$8 sps:$4 sm:$0xff]  }
 0x56f   :  { %v710_v58 = vsel %vm702_vm0, %v696_v51, %v706_v55  ;;  %v2813_v50 = vld [vmem:[#allocation2 + $0x134] ss:$8 sps:$4 sm:$0xff]   ;;  %v2808_v51 = vld [vmem:[#allocation2 + $0x30] ss:$8 sps:$4 sm:$0xff]   ;;  %v2816_v53 = vld [vmem:[#allocation2 + $0x44] ss:$8 sps:$4 sm:$0xff]  }
 0x570   :  { %v3192_v60 = vpack.c.bf16 %v710_v58, %v709_v57  ;;  %v708_v61 = vsel %vm700_vm2, %v688_v54, %v704_v56  ;;  %v2811_v52 = vld [vmem:[#allocation2 + $0x130] ss:$8 sps:$4 sm:$0xff]   ;;  %v2819_v54 = vld [vmem:[#allocation2 + $0x144] ss:$8 sps:$4 sm:$0xff]   ;;  %v2814_v55 = vld [vmem:[#allocation2 + $0x40] ss:$8 sps:$4 sm:$0xff]  }
 0x571   :  { %v3194_v62 = vpack.c.bf16 %v708_v61, %v707_v59  ;;  %v2817_v56 = vld [vmem:[#allocation2 + $0x140] ss:$8 sps:$4 sm:$0xff]   ;;  %v2822_v57 = vld [vmem:[#allocation2 + $0x54] ss:$8 sps:$4 sm:$0xff]   ;;  %v2820_v59 = vld [vmem:[#allocation2 + $0x50] ss:$8 sps:$4 sm:$0xff]  }
 0x572   :  { %v1062_v39 = vrot.slane %v3192_v60, 2  ;;  %v1219_v40 = vrot.slane %v3192_v60, 6  ;;  %v2825_v58 = vld [vmem:[#allocation2 + $0x154] ss:$8 sps:$4 sm:$0xff]   ;;  %v2823_v61 = vld [vmem:[#allocation2 + $0x150] ss:$8 sps:$4 sm:$0xff]  }
 0x573   :  { %v747_v1 = vrot.slane %v3194_v62, 2  ;;  %v904_v2 = vrot.slane %v3194_v62, 6 }
 0x575   :  { %862 = vmatmul.mubr.bf16.vlgmr.msra.gmra.mrb[20].mxu1 %v747_v1  ;;  %1019 = vmatmul.mubr.bf16.vlgmr.msra.gmra.mrb[16].mxu0 %v904_v2  ;;  %v2826_v1 = vld [vmem:[#allocation2 + $0x60] ss:$8 sps:$4 sm:$0xff]  }
 0x576   :  { %1145 = vmatpush1.bf16.msra.mxu1 %v2742_v63  ;;  %1302 = vmatpush1.bf16.msra.mxu0 %v2745_v0  ;;  %v2828_v63 = vld [vmem:[#allocation2 + $0x64] ss:$8 sps:$4 sm:$0xff]   ;;  %v2829_v2 = vld [vmem:[#allocation2 + $0x160] ss:$8 sps:$4 sm:$0xff]  }
 0x577   :  { %1146 = vmatprep.subr.bf16.mxu1 %v2750_v3  ;;  %1303 = vmatprep.subr.bf16.mxu0 %v2753_v4  ;;  %v2831_v0 = vld [vmem:[#allocation2 + $0x164] ss:$8 sps:$4 sm:$0xff]   ;;  %v2834_v3 = vld [vmem:[#allocation2 + $0x74] ss:$8 sps:$4 sm:$0xff]  }
 0x578   :  { %1176 = vmatprep.mubr.bf16.mxu1 %v2970_v27  ;;  %1333 = vmatprep.mubr.bf16.mxu0 %v2970_v27  ;;  %v2837_v4 = vld [vmem:[#allocation2 + $0x174] ss:$8 sps:$4 sm:$0xff]  }
 0x57a   :  { %1147 = vmatpush1.bf16.msra.mxu1 %v2748_v5  ;;  %1304 = vmatpush1.bf16.msra.mxu0 %v2751_v6  ;;  %v2832_v5 = vld [vmem:[#allocation2 + $0x70] ss:$8 sps:$4 sm:$0xff]  }
 0x57b   :  { %1148 = vmatprep.subr.bf16.mxu1 %v2756_v7  ;;  %1305 = vmatprep.subr.bf16.mxu0 %v2759_v8  ;;  %v2835_v6 = vld [vmem:[#allocation2 + $0x170] ss:$8 sps:$4 sm:$0xff]   ;;  %v2840_v7 = vld [vmem:[#allocation2 + $0x204] ss:$8 sps:$4 sm:$0xff]  }
 0x57c   :  { %v2843_v8 = vld [vmem:[#allocation2 + $0x304] ss:$8 sps:$4 sm:$0xff]  }
 0x57e   :  { %1149 = vmatpush1.bf16.msra.mxu1 %v2754_v9  ;;  %1306 = vmatpush1.bf16.msra.mxu0 %v2757_v10  ;;  %v2838_v9 = vld [vmem:[#allocation2 + $0x200] ss:$8 sps:$4 sm:$0xff]  }
 0x57f   :  { %1150 = vmatprep.subr.bf16.mxu1 %v2762_v11  ;;  %1307 = vmatprep.subr.bf16.mxu0 %v2765_v14  ;;  %v2841_v10 = vld [vmem:[#allocation2 + $0x300] ss:$8 sps:$4 sm:$0xff]   ;;  %v1463_v11 = vrot.slane %v3194_v62, 4  ;;  %v2846_v14 = vld [vmem:[#allocation2 + $0x214] ss:$8 sps:$4 sm:$0xff]  }
 0x582   :  { %1151 = vmatpush1.bf16.msra.mxu1 %v2760_v16  ;;  %1308 = vmatpush1.bf16.msra.mxu0 %v2763_v17  ;;  %v2849_v16 = vld [vmem:[#allocation2 + $0x314] ss:$8 sps:$4 sm:$0xff]   ;;  %v2844_v17 = vld [vmem:[#allocation2 + $0x210] ss:$8 sps:$4 sm:$0xff]  }
 0x583   :  { %1152 = vmatprep.subr.bf16.mxu1 %v2768_v18  ;;  %1309 = vmatprep.subr.bf16.mxu0 %v2771_v19  ;;  %v2847_v18 = vld [vmem:[#allocation2 + $0x310] ss:$8 sps:$4 sm:$0xff]   ;;  %v2852_v19 = vld [vmem:[#allocation2 + $0x224] ss:$8 sps:$4 sm:$0xff]  }
 0x586   :  { %1153 = vmatpush1.bf16.msra.mxu1 %v2766_v20  ;;  %1310 = vmatpush1.bf16.msra.mxu0 %v2769_v21  ;;  %v2855_v20 = vld [vmem:[#allocation2 + $0x324] ss:$8 sps:$4 sm:$0xff]   ;;  %v2850_v21 = vld [vmem:[#allocation2 + $0x220] ss:$8 sps:$4 sm:$0xff]  }
 0x587   :  { %1154 = vmatprep.subr.bf16.mxu1 %v2774_v23  ;;  %1311 = vmatprep.subr.bf16.mxu0 %v2777_v24  ;;  %v2853_v23 = vld [vmem:[#allocation2 + $0x320] ss:$8 sps:$4 sm:$0xff]   ;;  %v2861_v24 = vld [vmem:[#allocation2 + $0x334] ss:$8 sps:$4 sm:$0xff]  }
 0x58a   :  { %1155 = vmatpush1.bf16.msra.mxu1 %v2772_v25  ;;  %1312 = vmatpush1.bf16.msra.mxu0 %v2775_v26  ;;  %v2856_v25 = vld [vmem:[#allocation2 + $0x230] ss:$8 sps:$4 sm:$0xff]  }
 0x58b   :  { %1156 = vmatprep.subr.bf16.mxu1 %v2780_v28  ;;  %1313 = vmatprep.subr.bf16.mxu0 %v2783_v29  ;;  %v2859_v26 = vld [vmem:[#allocation2 + $0x330] ss:$8 sps:$4 sm:$0xff]   ;;  %v2864_v28 = vld [vmem:[#allocation2 + $0x244] ss:$8 sps:$4 sm:$0xff]  }
 0x58c   :  { %v2867_v29 = vld [vmem:[#allocation2 + $0x344] ss:$8 sps:$4 sm:$0xff]  }
 0x58e   :  { %1157 = vmatpush1.bf16.msra.mxu1 %v2778_v30  ;;  %1314 = vmatpush1.bf16.msra.mxu0 %v2781_v31  ;;  %v2862_v30 = vld [vmem:[#allocation2 + $0x240] ss:$8 sps:$4 sm:$0xff]   ;;  %v2870_v31 = vld [vmem:[#allocation2 + $0x254] ss:$8 sps:$4 sm:$0xff]  }
 0x58f   :  { %1158 = vmatprep.subr.bf16.mxu1 %v2786_v22  ;;  %1315 = vmatprep.subr.bf16.mxu0 %v2789_v32  ;;  %v2873_v22 = vld [vmem:[#allocation2 + $0x354] ss:$8 sps:$4 sm:$0xff]   ;;  %v2868_v32 = vld [vmem:[#allocation2 + $0x250] ss:$8 sps:$4 sm:$0xff]  }
 0x592   :  { %1159 = vmatpush1.bf16.msra.mxu1 %v2784_v33  ;;  %1316 = vmatpush1.bf16.msra.mxu0 %v2787_v34  ;;  %v2871_v33 = vld [vmem:[#allocation2 + $0x350] ss:$8 sps:$4 sm:$0xff]   ;;  %v2876_v34 = vld [vmem:[#allocation2 + $0x264] ss:$8 sps:$4 sm:$0xff]  }
 0x593   :  { %1422 = vmatprep.subr.bf16.mxu1 %v2792_v35  ;;  %1545 = vmatprep.subr.bf16.mxu0 %v2795_v36  ;;  %v2879_v35 = vld [vmem:[#allocation2 + $0x364] ss:$8 sps:$4 sm:$0xff]   ;;  %v2874_v36 = vld [vmem:[#allocation2 + $0x260] ss:$8 sps:$4 sm:$0xff]  }
 0x595   :  { %1177 = vmatmul.mubr.bf16.vlgmr.msra.gmra.mrb[24].mxu1 %v1062_v39  ;;  %1334 = vmatmul.mubr.bf16.vlgmr.msra.gmra.mrb[20].mxu0 %v1219_v40  ;;  %v2885_v39 = vld [vmem:[#allocation2 + $0x374] ss:$8 sps:$4 sm:$0xff]   ;;  %v2880_v40 = vld [vmem:[#allocation2 + $0x270] ss:$8 sps:$4 sm:$0xff]  }
 0x596   :  { %1423 = vmatpush1.bf16.msra.mxu1 %v2790_v37  ;;  %1546 = vmatpush1.bf16.msra.mxu0 %v2793_v38  ;;  %v2877_v37 = vld [vmem:[#allocation2 + $0x360] ss:$8 sps:$4 sm:$0xff]   ;;  %v2882_v38 = vld [vmem:[#allocation2 + $0x274] ss:$8 sps:$4 sm:$0xff]  }
 0x597   :  { %1424 = vmatprep.subr.bf16.mxu1 %v2798_v41  ;;  %1547 = vmatprep.subr.bf16.mxu0 %v2801_v42  ;;  %v2883_v41 = vld [vmem:[#allocation2 + $0x370] ss:$8 sps:$4 sm:$0xff]   ;;  %v1707_v42 = vrot.slane %v3192_v60, 4 }
 0x598   :  { %1454 = vmatprep.mubr.bf16.mxu1 %v2970_v27  ;;  %1577 = vmatprep.mubr.bf16.mxu0 %v2970_v27 }
 0x59a   :  { %1425 = vmatpush1.bf16.msra.mxu1 %v2796_v43  ;;  %1548 = vmatpush1.bf16.msra.mxu0 %v2799_v44  ;;  %v2886_v43 = vld [vmem:[#allocation4 + $0x40] sm:$0xff]  }
 0x59b   :  { %1426 = vmatprep.subr.bf16.mxu1 %v2804_v45  ;;  %1549 = vmatprep.subr.bf16.mxu0 %v2807_v46  ;;  %v2887_v44 = vld [vmem:[#allocation4] sm:$0xff]   ;;  %v2888_v45 = vld [vmem:[#allocation4 + $0x48] sm:$0xff]  }
 0x59c   :  { %v2889_v46 = vld [vmem:[#allocation4 + $0x8] sm:$0xff]  }
 0x59e   :  { %1427 = vmatpush1.bf16.msra.mxu1 %v2802_v47  ;;  %1550 = vmatpush1.bf16.msra.mxu0 %v2805_v48  ;;  %v2890_v47 = vld [vmem:[#allocation4 + $0x50] sm:$0xff]  }
 0x59f   :  { %1428 = vmatprep.subr.bf16.mxu1 %v2810_v49  ;;  %1551 = vmatprep.subr.bf16.mxu0 %v2813_v50  ;;  %v2891_v48 = vld [vmem:[#allocation4 + $0x10] sm:$0xff]   ;;  %v2892_v49 = vld [vmem:[#allocation4 + $0x58] sm:$0xff]  }
 0x5a0   :  { %v2893_v50 = vld [vmem:[#allocation4 + $0x18] sm:$0xff]  }
 0x5a2   :  { %1429 = vmatpush1.bf16.msra.mxu1 %v2808_v51  ;;  %1552 = vmatpush1.bf16.msra.mxu0 %v2811_v52  ;;  %v2894_v51 = vld [vmem:[#allocation4 + $0x60] sm:$0xff]  }
 0x5a3   :  { %1430 = vmatprep.subr.bf16.mxu1 %v2816_v53  ;;  %1553 = vmatprep.subr.bf16.mxu0 %v2819_v54  ;;  %v2895_v52 = vld [vmem:[#allocation4 + $0x20] sm:$0xff]   ;;  %v2897_v53 = vld [vmem:[#allocation4 + $0x28] sm:$0xff]   ;;  %v2898_v54 = vld [vmem:[#allocation4 + $0x70] sm:$0xff]  }
 0x5a6   :  { %1431 = vmatpush1.bf16.msra.mxu1 %v2814_v55  ;;  %1554 = vmatpush1.bf16.msra.mxu0 %v2817_v56  ;;  %v2899_v55 = vld [vmem:[#allocation4 + $0x30] sm:$0xff]   ;;  %v2900_v56 = vld [vmem:[#allocation4 + $0x78] sm:$0xff]  }
 0x5a7   :  { %1432 = vmatprep.subr.bf16.mxu1 %v2822_v57  ;;  %1555 = vmatprep.subr.bf16.mxu0 %v2825_v58  ;;  %v2901_v57 = vld [vmem:[#allocation4 + $0x38] sm:$0xff]   ;;  %v2902_v58 = vld [vmem:[#allocation4 + $0x80] sm:$0xff]  }
 0x5aa   :  { %1433 = vmatpush1.bf16.msra.mxu1 %v2820_v59  ;;  %1556 = vmatpush1.bf16.msra.mxu0 %v2823_v61  ;;  %v2971_v59 = vmov 0.0   ;;  %v2903_v61 = vld [vmem:[#allocation4 + $0x88] sm:$0xff]  }
 0x5ab   :  { %1434 = vmatprep.subr.bf16.mxu1 %v2828_v63  ;;  %1557 = vmatprep.subr.bf16.mxu0 %v2831_v0  ;;  %v2904_v63 = vld [vmem:[#allocation4 + $0x90] sm:$0xff]   ;;  %v2905_v0 = vld [vmem:[#allocation4 + $0x98] sm:$0xff]  }
 0x5ae   :  { %1435 = vmatpush1.bf16.msra.mxu1 %v2826_v1  ;;  %1558 = vmatpush1.bf16.msra.mxu0 %v2829_v2  ;;  %v2906_v1 = vld [vmem:[#allocation4 + $0xa0] sm:$0xff]  }
 0x5af   :  { %1436 = vmatprep.subr.bf16.mxu1 %v2834_v3  ;;  %1559 = vmatprep.subr.bf16.mxu0 %v2837_v4 }
 0x5b2   :  { %1437 = vmatpush1.bf16.msra.mxu1 %v2832_v5  ;;  %1560 = vmatpush1.bf16.msra.mxu0 %v2835_v6 }
 0x5b3   :  { %1666 = vmatprep.subr.bf16.mxu1 %v2840_v7  ;;  %1789 = vmatprep.subr.bf16.mxu0 %v2843_v8 }
 0x5b5   :  { %1455 = vmatmul.mubr.bf16.vlgmr.msra.gmra.mrb[28].mxu1 %v3194_v62  ;;  %1578 = vmatmul.mubr.bf16.vlgmr.msra.gmra.mrb[24].mxu0 %v1463_v11  ;;  %v2858_v62 = vld [vmem:[#allocation2 + $0x234] ss:$8 sps:$4 sm:$0xff]  }
 0x5b6   :  { %1667 = vmatpush1.bf16.msra.mxu1 %v2838_v9  ;;  %1790 = vmatpush1.bf16.msra.mxu0 %v2841_v10 }
 0x5b7   :  { %1668 = vmatprep.subr.bf16.mxu1 %v2846_v14  ;;  %1791 = vmatprep.subr.bf16.mxu0 %v2849_v16 }
 0x5b8   :  { %1698 = vmatprep.mubr.bf16.mxu1 %v2970_v27  ;;  %1821 = vmatprep.mubr.bf16.mxu0 %v2970_v27  ;;  %v2865_v27 = vld [vmem:[#allocation2 + $0x340] ss:$8 sps:$4 sm:$0xff]  }
 0x5ba   :  { %1669 = vmatpush1.bf16.msra.mxu1 %v2844_v17  ;;  %1792 = vmatpush1.bf16.msra.mxu0 %v2847_v18 }
 0x5bb   :  { %1670 = vmatprep.subr.bf16.mxu1 %v2852_v19  ;;  %1793 = vmatprep.subr.bf16.mxu0 %v2855_v20 }
 0x5be   :  { %1671 = vmatpush1.bf16.msra.mxu1 %v2850_v21  ;;  %1794 = vmatpush1.bf16.msra.mxu0 %v2853_v23 }
 0x5bf   :  { %1672 = vmatprep.subr.bf16.mxu1 %v2858_v62  ;;  %1795 = vmatprep.subr.bf16.mxu0 %v2861_v24 }
 0x5c2   :  { %1673 = vmatpush1.bf16.msra.mxu1 %v2856_v25  ;;  %1796 = vmatpush1.bf16.msra.mxu0 %v2859_v26 }
 0x5c3   :  { %1674 = vmatprep.subr.bf16.mxu1 %v2864_v28  ;;  %1797 = vmatprep.subr.bf16.mxu0 %v2867_v29 }
 0x5c6   :  { %1675 = vmatpush1.bf16.msra.mxu1 %v2862_v30  ;;  %1798 = vmatpush1.bf16.msra.mxu0 %v2865_v27 }
 0x5c7   :  { %1676 = vmatprep.subr.bf16.mxu1 %v2870_v31  ;;  %1799 = vmatprep.subr.bf16.mxu0 %v2873_v22 }
 0x5ca   :  { %1677 = vmatpush1.bf16.msra.mxu1 %v2868_v32  ;;  %1800 = vmatpush1.bf16.msra.mxu0 %v2871_v33 }
 0x5cb   :  { %1678 = vmatprep.subr.bf16.mxu1 %v2876_v34  ;;  %1801 = vmatprep.subr.bf16.mxu0 %v2879_v35 }
 0x5ce   :  { %1679 = vmatpush1.bf16.msra.mxu1 %v2874_v36  ;;  %1802 = vmatpush1.bf16.msra.mxu0 %v2877_v37  ;;  %v2467_v36 = vld [vmem:[%s3260_s7 + $0x3] ss:$8 sm:$0x3] }
 0x5cf   :  { %1680 = vmatprep.subr.bf16.mxu1 %v2882_v38  ;;  %1803 = vmatprep.subr.bf16.mxu0 %v2885_v39 }
 0x5d2   :  { %1681 = vmatpush1.bf16.msra.mxu1 %v2880_v40  ;;  %1804 = vmatpush1.bf16.msra.mxu0 %v2883_v41 }
 0x5d3   :  { %2539 = vmatprep.subr.bf16.mxu1 %v2886_v43  ;;  %2600 = vmatprep.subr.bf16.mxu0 %v2971_v59 }
 0x5d5   :  { %1699 = vmatmul.mubr.bf16.vlgmr.msra.gmra.mrb[32].mxu1 %v3192_v60  ;;  %1822 = vmatmul.mubr.bf16.vlgmr.msra.gmra.mrb[28].mxu0 %v1707_v42  ;;  %v2896_v60 = vld [vmem:[#allocation4 + $0x68] sm:$0xff]  }
 0x5d6   :  { %2540 = vmatpush3.bf16.msra.mxu1 %v2887_v44  ;;  %2601 = vmatpush3.bf16.msra.mxu0 %v2902_v58 }
 0x5d7   :  { %2541 = vmatprep.subr.bf16.mxu1 %v2888_v45  ;;  %2602 = vmatprep.subr.bf16.mxu0 %v2971_v59 }
 0x5d8   :  { %2616 = vmatprep.mubr.msk.bf16.mxu0 %vm2972_vm5, %v2971_v59 }
 0x5da   :  { %2542 = vmatpush3.bf16.msra.mxu1 %v2889_v46  ;;  %2603 = vmatpush3.bf16.msra.mxu0 %v2903_v61  ;;  %v1842_v46 = vrot.slane %v2467_v36, %v381_v13  ;;  %v2907_v13 = vld [vmem:[#allocation4 + $0xa8] sm:$0xff]  }
 0x5db   :  { %2543 = vmatprep.subr.bf16.mxu1 %v2890_v47  ;;  %2604 = vmatprep.subr.bf16.mxu0 %v2971_v59 }
 0x5de   :  { %2544 = vmatpush3.bf16.msra.mxu1 %v2891_v48  ;;  %2605 = vmatpush3.bf16.msra.mxu0 %v2904_v63  ;;  %v2910_v63 = vld [vmem:[#allocation4 + $0x100] sm:$0xff]  }
 0x5df   :  { %2545 = vmatprep.subr.bf16.mxu1 %v2892_v49  ;;  %2606 = vmatprep.subr.bf16.mxu0 %v2971_v59 }
 0x5e2   :  { %2546 = vmatpush3.bf16.msra.mxu1 %v2893_v50  ;;  %2607 = vmatpush3.bf16.msra.mxu0 %v2905_v0  ;;  %v1846_v50 = vrot.slane %v2467_v36, %v385_v15  ;;  %v2909_v15 = vld [vmem:[#allocation4 + $0xb8] sm:$0xff]   ;;  %v2911_v0 = vld [vmem:[#allocation4 + $0x108] sm:$0xff]  }
 0x5e3   :  { %2547 = vmatprep.subr.bf16.mxu1 %v2894_v51  ;;  %2608 = vmatprep.subr.bf16.mxu0 %v2971_v59 }
 0x5e6   :  { %2548 = vmatpush3.bf16.msra.mxu1 %v2895_v52  ;;  %2609 = vmatpush3.bf16.msra.mxu0 %v2906_v1 }
 0x5e7   :  { %2549 = vmatprep.subr.bf16.mxu1 %v2896_v60  ;;  %2610 = vmatprep.subr.bf16.mxu0 %v2971_v59 }
 0x5ea   :  { %2550 = vmatpush3.bf16.msra.mxu1 %v2897_v53  ;;  %2611 = vmatpush3.bf16.msra.mxu0 %v2907_v13 }
 0x5eb   :  { %2551 = vmatprep.subr.bf16.mxu1 %v2898_v54  ;;  %2612 = vmatprep.subr.bf16.mxu0 %v2971_v59 }
 0x5ee   :  { %2552 = vmatpush3.bf16.msra.mxu1 %v2899_v55  ;;  %2613 = vmatpush3.bf16.msra.mxu0 %v2908_v12 }
 0x5ef   :  { %2553 = vmatprep.subr.bf16.mxu1 %v2900_v56  ;;  %2614 = vmatprep.subr.bf16.mxu0 %v2971_v59 }
 0x5f2   :  { %2554 = vmatpush3.bf16.msra.mxu1 %v2901_v57  ;;  %2615 = vmatpush3.bf16.msra.mxu0 %v2909_v15 }
 0x5f3   :  { %2620 = vmatprep.subr.bf16.mxu1 %v2971_v59  ;;  %2632 = vmatprep.subr.bf16.mxu0 %v2971_v59 }
 0x648   :  { %v863_v2 = vpop.f32.mrb[20].mxu1  ;;  %v1020_v3 = vpop.f32.mrb[16].mxu0 }
 0x649   :  { %v865_v4 = vpop.f32.mrb[21].mxu1  ;;  %v1022_v5 = vpop.f32.mrb[17].mxu0 }
 0x64a   :  { %v867_v6 = vpop.f32.mrb[22].mxu1  ;;  %v1024_v7 = vpop.f32.mrb[18].mxu0 }
 0x64b   :  { %v868_v8 = vpop.f32.mrb[23].mxu1  ;;  %v1025_v9 = vpop.f32.mrb[19].mxu0 }
 0x668   :  { %v1178_v10 = vpop.f32.mrb[24].mxu1  ;;  %v1335_v11 = vpop.f32.mrb[20].mxu0 }
 0x669   :  { %v1180_v14 = vpop.f32.mrb[25].mxu1  ;;  %v1337_v16 = vpop.f32.mrb[21].mxu0 }
 0x66a   :  { %v1182_v17 = vpop.f32.mrb[26].mxu1  ;;  %v1339_v18 = vpop.f32.mrb[22].mxu0 }
 0x66b   :  { %v1183_v19 = vpop.f32.mrb[27].mxu1  ;;  %v1340_v20 = vpop.f32.mrb[23].mxu0 }
 0x688   :  { %v1456_v21 = vpop.f32.mrb[28].mxu1  ;;  %v1579_v23 = vpop.f32.mrb[24].mxu0 }
 0x689   :  { %v1457_v62 = vadd.f32 %v1456_v21, %v863_v2  ;;  %v1580_v24 = vadd.f32 %v1579_v23, %v1020_v3  ;;  %v1458_v25 = vpop.f32.mrb[29].mxu1  ;;  %v1581_v26 = vpop.f32.mrb[25].mxu0  ;;  %v1891_v2 = vld [vmem:[%s3260_s7 + $0x4] ss:$0 sm:$0xff] }
 0x68a   :  { %v1459_v28 = vadd.f32 %v1458_v25, %v865_v4  ;;  %v1582_v29 = vadd.f32 %v1581_v26, %v1022_v5  ;;  %v1460_v30 = vpop.f32.mrb[30].mxu1  ;;  %v1583_v27 = vpop.f32.mrb[26].mxu0  ;;  %v2914_v25 = vld [vmem:[#allocation4 + $0x180] sm:$0xff]   ;;  %v2915_v26 = vld [vmem:[#allocation4 + $0x188] sm:$0xff]  }
 0x68b   :  { %v1830_v31 = vadd.f32 %v1580_v24, %v1457_v62  ;;  %v1461_v22 = vpop.f32.mrb[31].mxu1  ;;  %v1584_v32 = vpop.f32.mrb[27].mxu0 }
 0x68c   :  { %v1831_v33 = vadd.f32 %v1582_v29, %v1459_v28  ;;  %v2151_v28 = vld [vmem:[%s3260_s7 + $0x6] ss:$0 sm:$0xff] }
 0x6a8   :  { %v1700_v34 = vpop.f32.mrb[32].mxu1  ;;  %v1823_v35 = vpop.f32.mrb[28].mxu0 }
 0x6a9   :  { %v1701_v37 = vadd.f32 %v1700_v34, %v1178_v10  ;;  %v1824_v38 = vadd.f32 %v1823_v35, %v1335_v11  ;;  %v1702_v39 = vpop.f32.mrb[33].mxu1  ;;  %v1825_v40 = vpop.f32.mrb[29].mxu0  ;;  %v2912_v11 = vld [vmem:[#allocation4 + $0x110] sm:$0xff]  }
 0x6aa   :  { %v1703_v41 = vadd.f32 %v1702_v39, %v1180_v14  ;;  %v1826_v42 = vadd.f32 %v1825_v40, %v1337_v16  ;;  %v1704_v43 = vpop.f32.mrb[34].mxu1  ;;  %v1827_v44 = vpop.f32.mrb[30].mxu0  ;;  %v2913_v14 = vld [vmem:[#allocation4 + $0x118] sm:$0xff]   ;;  %v2049_v16 = vld [vmem:[%s3260_s7 + $0x5] ss:$0 sm:$0xff] }
 0x6ab   :  { %v1832_v45 = vadd.f32 %v1824_v38, %v1701_v37  ;;  %v1705_v47 = vpop.f32.mrb[35].mxu1  ;;  %v1828_v48 = vpop.f32.mrb[31].mxu0 }
 0x6ac   :  { %v1833_v49 = vadd.f32 %v1826_v42, %v1703_v41 }
 0x6ad   :  { %v1834_v51 = vadd.f32 %v1832_v45, %v1830_v31 }
 0x6ae   :  { %v1835_v52 = vadd.f32 %v1833_v49, %v1831_v33 }
 0x6af   :  { %v1849_v60 = vadd.f32 %v1842_v46, %v1834_v51 }
 0x6b0   :  { %v1850_v53 = vadd.f32 %v1846_v50, %v1835_v52 }
 0x6b1   :  { %v1853_v54 = vmul.f32 0.1, %v1849_v60  ;;  %vm1851_vm3 = vcmp.gt.f32.partialorder %v1849_v60, 0.0 }
 0x6b2   :  { %vm1852_vm4 = vcmp.gt.f32.partialorder %v1850_v53, 0.0  ;;  %v1854_v55 = vmul.f32 0.1, %v1850_v53 }
 0x6b3   :  { %v1855_v56 = vsel %vm1851_vm3, %v1849_v60, %v1853_v54 }
 0x6b4   :  { %v1856_v57 = vsel %vm1852_vm4, %v1850_v53, %v1854_v55  ;;  %v1889_v61 = vpack.c.bf16 %v1855_v56, %v1855_v56 }
 0x6b5   :  { %v1890_v58 = vpack.c.bf16 %v1856_v57, %v1856_v57 }
 0x6b7   :  { %2020 = vmatprep.mubr.bf16.mxu1 %v1890_v58 }
 0x6b8   :  { %2021 = vmatmul.mubr.bf16.vlgmr.msra.gmra.mrb[36].mxu1 %v1889_v61 }
 0x6b9   :  { %2628 = vmatprep.mubr.msk.bf16.mxu1 %vm2972_vm5, %v2971_v59  ;;  %2621 = vmatpush3.bf16.msra.mxu1 %v2910_v63 }
 0x6ba   :  { %2622 = vmatprep.subr.bf16.mxu1 %v2971_v59 }
 0x6bd   :  { %2623 = vmatpush3.bf16.msra.mxu1 %v2911_v0 }
 0x6be   :  { %2624 = vmatprep.subr.bf16.mxu1 %v2971_v59 }
 0x6c1   :  { %2625 = vmatpush3.bf16.msra.mxu1 %v2912_v11 }
 0x6c2   :  { %2626 = vmatprep.subr.bf16.mxu1 %v2971_v59 }
 0x6c5   :  { %2627 = vmatpush3.bf16.msra.mxu1 %v2913_v14 }
 0x78b   :  { %v2555_v1 = vpop.f32.mrb[36].mxu1 }
 0x78c   :  { %v2556_v3 = vpop.f32.mrb[37].mxu1 }
 0x78d   :  { %v2557_v4 = vadd.f32 %v2556_v3, %v2555_v1  ;;  %v2558_v5 = vpop.f32.mrb[38].mxu1 }
 0x78e   :  { %v2559_v6 = vpop.f32.mrb[39].mxu1 }
 0x78f   :  { %v2023_v7 = vadd.f32 %v2557_v4, %v1891_v2 }
 0x791   :  { %vm2028_vm6 = vcmp.gt.f32.partialorder %v2023_v7, 0.0  ;;  %v2029_v8 = vmul.f32 0.1, %v2023_v7 }
 0x793   :  { %v2030_v9 = vsel %vm2028_vm6, %v2023_v7, %v2029_v8 }
 0x794   :  { %v2048_v10 = vpack.c.bf16 %v2030_v9, %v2030_v9 }
 0x796   :  { %2617 = vmatmul.mubr.bf16.vlgmr.msra.gmra.mrb[32].mxu0 %v2048_v10 }
 0x797   :  { %2636 = vmatprep.mubr.msk.bf16.mxu0 %vm2972_vm5, %v2971_v59  ;;  %2633 = vmatpush3.bf16.msra.mxu0 %v2914_v25 }
 0x798   :  { %2634 = vmatprep.subr.bf16.mxu0 %v2971_v59  ;;  %v2229_v59 = vld [vmem:[%s3260_s7 + $0x7] ss:$0 sm:$0xff] }
 0x79b   :  { %2635 = vmatpush3.bf16.msra.mxu0 %v2915_v26 }
 0x869   :  { %v2132_v17 = vpop.f32.mrb[32].mxu0 }
 0x86a   :  { %v2133_v18 = vadd.f32 %v2132_v17, %v2049_v16  ;;  %v2618_v19 = vpop.f32.mrb[33].mxu0 }
 0x86b   :  { %v2135_v20 = vpop.f32.mrb[34].mxu0 }
 0x86c   :  { %vm2138_vm7 = vcmp.gt.f32.partialorder %v2133_v18, 0.0  ;;  %v2139_v21 = vmul.f32 0.1, %v2133_v18  ;;  %v2619_v23 = vpop.f32.mrb[35].mxu0 }
 0x86e   :  { %v2140_v62 = vsel %vm2138_vm7, %v2133_v18, %v2139_v21 }
 0x86f   :  { %v2150_v24 = vpack.c.bf16 %v2140_v62, %v2140_v62 }
 0x871   :  { %2629 = vmatmul.mubr.msk.bf16.vlgmr.msra.gmra.mrb[40].mxu1 %vm2176_vm8, %v2150_v24 }
 0x944   :  { %v2214_v29 = vpop.f32.mrb[40].mxu1 }
 0x945   :  { %v2215_v30 = vadd.f32 %v2214_v29, %v2151_v28  ;;  %v2630_v27 = vpop.f32.mrb[41].mxu1 }
 0x946   :  { %v2217_v31 = vpop.f32.mrb[42].mxu1 }
 0x947   :  { %vm2220_vm9 = vcmp.gt.f32.partialorder %v2215_v30, 0.0  ;;  %v2221_v22 = vmul.f32 0.1, %v2215_v30  ;;  %v2631_v32 = vpop.f32.mrb[43].mxu1 }
 0x949   :  { %v2222_v33 = vsel %vm2220_vm9, %v2215_v30, %v2221_v22 }
 0x94a   :  { %v2228_v34 = vpack.c.bf16 %v2222_v33, %v2222_v33 }
 0x94c   :  { %2637 = vmatmul.mubr.msk.bf16.vlgmr.msra.gmra.mrb[36].mxu0 %vm153_vm1, %v2228_v34 }
 0xa1f   :  { %v2279_v35 = vpop.f32.mrb[36].mxu0 }
 0xa20   :  { %v2280_v36 = vadd.f32 %v2279_v35, %v2229_v59  ;;  %v2638_v37 = vpop.f32.mrb[37].mxu0 }
 0xa21   :  { %v2282_v38 = vpop.f32.mrb[38].mxu0 }
 0xa22   :  { %2286 = vst.msk [vmem:[%s3261_s8] sm:$0xf] %vm2285_vm10, %v2280_v36  ;;  %v2639_v39 = vpop.f32.mrb[39].mxu0 }
 0xa23   :  { %2291 = vsyncpa [#allocation3], 1 }
 0xa24   :  { %2292 = vsyncpa [#allocation5], 1 }

</bundles_post_ra>
